<compile_context>
chip_gen: v6e
topology: v6e:2x2x1
jax: 0.10.0
libtpu: 0.0.40
codegen_flags: <defaults>
</compile_context>

<pallas_src>
import functools

import jax
import jax.numpy as jnp
from jax.experimental import pallas as pl
from jax.experimental.pallas import tpu as pltpu

PAD_IDX = 0


def _layer_norm(z, w, b, eps=1e-5):
    mu = jnp.mean(z, axis=-1, keepdims=True)
    zc = z - mu
    var = jnp.mean(zc * zc, axis=-1, keepdims=True)
    return zc * jax.lax.rsqrt(var + eps) * w + b


# ----------------------------------------------------------------------------
# Fused kernel (one batch-block per grid step)
# ----------------------------------------------------------------------------
def fused_forward_kernel(ids_ref, feats_ref, maskk_ref, maskq_ref, ranks_ref,
                         embed_ref,
                         wf1_ref, bf1_ref, wf2_ref, bf2_ref,
                         wqkv_ref, bqkv_ref, wo_ref, bo_ref,
                         ln1w_ref, ln1b_ref, w1_ref, b1_ref, w2_ref, b2_ref,
                         ln2w_ref, ln2b_ref,
                         wr_ref, br_ref, w3_ref, b3_ref, w4_ref, b4_ref,
                         o_ref, *, nhead, num_layers):
    Bb, S, _ = ids_ref.shape                     # (block_b, S, 1)
    V, E = embed_ref.shape
    dh = E // nhead
    M = Bb * S
    scale = 1.0 / float(dh) ** 0.5
    f32, bf16 = jnp.float32, jnp.bfloat16

    # ---- item embedding, fused as a one-hot matmul against the resident table
    # (row PAD_IDX is zero, so padding ids embed to zero like nn.Embedding).
    ids = ids_ref[...].reshape(M, 1)                                   # int32
    iota = jax.lax.broadcasted_iota(jnp.int32, (M, V), 1)
    onehot = (ids == iota).astype(bf16)
    emb = jnp.dot(onehot, embed_ref[...], preferred_element_type=f32)  # (M, E)
    # TODO(synk): for large vocabularies replace the one-hot matmul with a DMA
    #             row gather (scalar-prefetched ids + make_async_copy from HBM).

    # ---- feature_proj: Linear(2,E) on the VPU (K=2 matmul wastes the MXU),
    #      ReLU, then Linear(E,E) on the MXU.
    feats = feats_ref[...]                                             # (Bb,S,2)
    qty = feats[:, :, 0:1].reshape(M, 1)
    ucost = feats[:, :, 1:2].reshape(M, 1)
    wf1 = wf1_ref[...]                                                 # (2, E)
    h = qty * wf1[0:1, :] + ucost * wf1[1:2, :] + bf1_ref[...]
    h = jnp.maximum(h, 0.0)
    proj = jnp.dot(h.astype(bf16), wf2_ref[...],
                   preferred_element_type=f32) + bf2_ref[...]
    x = emb + proj                                                     # (M, E) f32

    # ---- additive key-padding bias, hoisted out of the layer loop (f32).
    bias = (maskk_ref[...] - 1.0) * jnp.float32(1e30)                  # (Bb,1,S)
    bias_bh = jnp.concatenate([bias] * nhead, axis=0)                  # (H*Bb,1,S)

    # ---- transformer encoder stack (post-LN, ReLU FFN, dropout = identity).
    # Static unroll is fine while num_layers is small; for deep stacks switch
    # to lax.fori_loop with dynamic wqkv_ref[l] indexing to bound live ranges.
    for l in range(num_layers):
        xb = x.astype(bf16)
        qkv = jnp.dot(xb, wqkv_ref[l], preferred_element_type=f32) + bqkv_ref[l]
        qkv3 = qkv.astype(bf16).reshape(Bb, S, 3 * E)

        # Head-batched attention: one (H*Bb)-batched einsum pair instead of
        # nhead tiny per-head matmuls + a serial accumulation chain.
        q_bh = jnp.concatenate(
            [qkv3[:, :, hh * dh:(hh + 1) * dh] for hh in range(nhead)], axis=0)
        k_bh = jnp.concatenate(
            [qkv3[:, :, E + hh * dh:E + (hh + 1) * dh] for hh in range(nhead)], axis=0)
        v_bh = jnp.concatenate(
            [qkv3[:, :, 2 * E + hh * dh:2 * E + (hh + 1) * dh] for hh in range(nhead)],
            axis=0)                                                     # (H*Bb,S,dh)

        s = jnp.einsum('bqd,bkd->bqk', q_bh, k_bh,
                       preferred_element_type=f32) * scale              # (H*Bb,S,S)
        s = s + bias_bh
        s = s - jnp.max(s, axis=-1, keepdims=True)
        p = jnp.exp(s)
        p = p * pl.reciprocal(jnp.sum(p, axis=-1, keepdims=True), approx=True)
        o_bh = jnp.einsum('bqk,bkd->bqd', p.astype(bf16), v_bh,
                          preferred_element_type=f32)                   # (H*Bb,S,dh)

        # Re-merge heads and apply ONE K=E output projection.
        o_cat = jnp.concatenate(
            [o_bh[hh * Bb:(hh + 1) * Bb] for hh in range(nhead)], axis=-1)  # (Bb,S,E)
        attn = jnp.dot(o_cat.reshape(M, E).astype(bf16), wo_ref[l],
                       preferred_element_type=f32) + bo_ref[l]

        x1 = _layer_norm(x + attn, ln1w_ref[l], ln1b_ref[l])
        hdn = jnp.dot(x1.astype(bf16), w1_ref[l], preferred_element_type=f32) + b1_ref[l]
        hdn = jnp.maximum(hdn, 0.0)
        y = jnp.dot(hdn.astype(bf16), w2_ref[l], preferred_element_type=f32) + b2_ref[l]
        x = _layer_norm(x1 + y, ln2w_ref[l], ln2b_ref[l])

    # ---- masked mean pool (exact division), rank projection, regressor head.
    enc = x.reshape(Bb, S, E)
    mq = maskq_ref[...]                                                 # (Bb,S,1)
    summed = jnp.sum(enc * mq, axis=1)                                  # (Bb,E)
    cnt = jnp.maximum(jnp.sum(mq, axis=1), 1.0)                         # clamp(min=1)
    pooled = summed / cnt                                               # exact divide
    ranks = ranks_ref[...].reshape(Bb, 1)
    pooled = pooled + ranks * wr_ref[...] + br_ref[...]                 # rank_proj (K=1) on VPU

    h2 = jnp.dot(pooled.astype(bf16), w3_ref[...],
                 preferred_element_type=f32) + b3_ref[...]
    h2 = jnp.maximum(h2, 0.0)
    # Final Linear(E//2, 1): VPU multiply + lane reduction instead of an N=1 MXU matmul.
    out = jnp.sum(h2 * w4_ref[...], axis=-1, keepdims=True) + b4_ref[...]   # (Bb,1)
    o_ref[...] = out.reshape(Bb, 1, 1)


# ----------------------------------------------------------------------------
# Parameters + full forward
# ----------------------------------------------------------------------------
def init_params(key, vocab_size, E, nhead, num_layers, F):
    bf16, f32 = jnp.bfloat16, jnp.float32

    def nrm(k, shape, dtype, scale=0.05):
        return (scale * jax.random.normal(k, shape)).astype(dtype)

    keys = iter(jax.random.split(key, 16))
    L = num_layers
    embed = nrm(next(keys), (vocab_size, E), f32)
    embed = embed.at[PAD_IDX].set(0.0).astype(bf16)          # padding_idx=0 row is zero
    return dict(
        embed=embed,
        # feature_proj
        wf1_t=nrm(next(keys), (2, E), f32), bf1=jnp.zeros((1, E), f32),
        wf2_t=nrm(next(keys), (E, E), bf16), bf2=jnp.zeros((1, E), f32),
        # encoder layers, stacked on leading L axis
        wqkv_t=nrm(next(keys), (L, E, 3 * E), bf16), bqkv=jnp.zeros((L, 1, 3 * E), f32),
        wo_t=nrm(next(keys), (L, E, E), bf16), bo=jnp.zeros((L, 1, E), f32),
        ln1w=jnp.ones((L, 1, E), f32), ln1b=jnp.zeros((L, 1, E), f32),
        w1_t=nrm(next(keys), (L, E, F), bf16), b1=jnp.zeros((L, 1, F), f32),
        w2_t=nrm(next(keys), (L, F, E), bf16), b2=jnp.zeros((L, 1, E), f32),
        ln2w=jnp.ones((L, 1, E), f32), ln2b=jnp.zeros((L, 1, E), f32),
        # rank projection + regressor head (w4 stored as a row for VPU reduction)
        wr_t=nrm(next(keys), (1, E), f32), br=jnp.zeros((1, E), f32),
        w3_t=nrm(next(keys), (E, E // 2), bf16), b3=jnp.zeros((1, E // 2), f32),
        w4_row=nrm(next(keys), (1, E // 2), f32), b4=jnp.zeros((1, 1), f32),
    )


def multi_item_transformer_forward(params, item_ids, quantities, unit_costs,
                                   mask, ranks, *, nhead, block_b=1):
    B, S = item_ids.shape
    num_layers = params["wqkv_t"].shape[0]
    assert B % block_b == 0, "batch must be divisible by the batch block size"

    # Per-batch inputs, shaped so every block's last two dims equal the full
    # array dims (TPU (8,128) block rule) and the batch dim leads.
    ids3 = item_ids.astype(jnp.int32).reshape(B, S, 1)
    feats = jnp.stack([quantities, unit_costs], axis=-1).astype(jnp.float32)  # (B,S,2)
    maskf = mask.astype(jnp.float32)
    mask_k = maskf.reshape(B, 1, S)          # keys:   1.0 = valid, 0.0 = padding
    mask_q = maskf.reshape(B, S, 1)          # pooling mask
    ranks3 = ranks.astype(jnp.float32).reshape(B, 1, 1)
    batched_inputs = [ids3, feats, mask_k, mask_q, ranks3]

    weight_names = ("embed", "wf1_t", "bf1", "wf2_t", "bf2",
                    "wqkv_t", "bqkv", "wo_t", "bo",
                    "ln1w", "ln1b", "w1_t", "b1", "w2_t", "b2", "ln2w", "ln2b",
                    "wr_t", "br", "w3_t", "b3", "w4_row", "b4")
    weights = [params[n] for n in weight_names]

    def batched_spec(a):                      # blocked over batch, pipelined
        nd = a.ndim
        return pl.BlockSpec((block_b,) + a.shape[1:],
                            lambda i: (i,) + (0,) * (nd - 1))

    def resident_spec(a):                     # full-array block, VMEM-resident
        nd = a.ndim
        return pl.BlockSpec(a.shape, lambda i: (0,) * nd)

    in_specs = ([batched_spec(a) for a in batched_inputs] +
                [resident_spec(w) for w in weights])

    kernel = functools.partial(fused_forward_kernel, nhead=nhead,
                               num_layers=num_layers)

    # NOTE: the (B,1) result is inherently narrow; at toy sizes the masked
    # store is negligible (lane-dense layout only matters if B scales).
    out = pl.pallas_call(
        kernel,
        out_shape=jax.ShapeDtypeStruct((B, 1, 1), jnp.float32),
        grid=(B // block_b,),
        in_specs=in_specs,
        out_specs=pl.BlockSpec((block_b, 1, 1), lambda i: (i, 0, 0)),
        compiler_params=pltpu.CompilerParams(
            dimension_semantics=("parallel",),          # megacore / v7x 2-TC sharding
            vmem_limit_bytes=48 * 1024 * 1024),         # fits the v7x 64 MiB budget
    )(*batched_inputs, *weights)
    return out.reshape(B, 1)


# ----------------------------------------------------------------------------
if __name__ == "__main__":
    vocab_size, embed_dim, nhead, num_layers, dim_ff = 32, 32, 4, 2, 64
    B, S = 2, 8

    params = init_params(jax.random.PRNGKey(0), vocab_size, embed_dim, nhead,
                         num_layers, dim_ff)

    kin = jax.random.split(jax.random.PRNGKey(0), 5)
    item_ids = jax.random.randint(kin[0], (B, S), 1, vocab_size)
    quantities = jax.random.uniform(kin[1], (B, S), dtype=jnp.float32)
    unit_costs = jax.random.uniform(kin[2], (B, S), dtype=jnp.float32)
    lengths = jnp.array([S, 5])
    mask = jnp.arange(S)[None, :] < lengths[:, None]                  # (B,S) bool, True=valid
    item_ids = jnp.where(mask, item_ids, PAD_IDX)
    ranks = jax.random.uniform(kin[3], (B, 1), dtype=jnp.float32)

    out = multi_item_transformer_forward(params, item_ids, quantities,
                                         unit_costs, mask, ranks,
                                         nhead=nhead, block_b=1)
    out = jax.block_until_ready(out)
    assert out.shape == (B, 1)
    assert bool(jnp.all(jnp.isfinite(out)))
    print("KERNEL_OK")
</pallas_src>

<mosaic_0001>
module attributes {stable_mosaic.version = 11 : i64} {
  func.func @fused_forward_kernel(%arg0: i32, %arg1: memref<1x8x1xi32, #tpu.memory_space<vmem>>, %arg2: memref<1x8x2xf32, #tpu.memory_space<vmem>>, %arg3: memref<1x1x8xf32, #tpu.memory_space<vmem>>, %arg4: memref<1x8x1xf32, #tpu.memory_space<vmem>>, %arg5: memref<1x1x1xf32, #tpu.memory_space<vmem>>, %arg6: memref<32x32xbf16, #tpu.memory_space<vmem>>, %arg7: memref<2x32xf32, #tpu.memory_space<vmem>>, %arg8: memref<1x32xf32, #tpu.memory_space<vmem>>, %arg9: memref<32x32xbf16, #tpu.memory_space<vmem>>, %arg10: memref<1x32xf32, #tpu.memory_space<vmem>>, %arg11: memref<2x32x96xbf16, #tpu.memory_space<vmem>>, %arg12: memref<2x1x96xf32, #tpu.memory_space<vmem>>, %arg13: memref<2x32x32xbf16, #tpu.memory_space<vmem>>, %arg14: memref<2x1x32xf32, #tpu.memory_space<vmem>>, %arg15: memref<2x1x32xf32, #tpu.memory_space<vmem>>, %arg16: memref<2x1x32xf32, #tpu.memory_space<vmem>>, %arg17: memref<2x32x64xbf16, #tpu.memory_space<vmem>>, %arg18: memref<2x1x64xf32, #tpu.memory_space<vmem>>, %arg19: memref<2x64x32xbf16, #tpu.memory_space<vmem>>, %arg20: memref<2x1x32xf32, #tpu.memory_space<vmem>>, %arg21: memref<2x1x32xf32, #tpu.memory_space<vmem>>, %arg22: memref<2x1x32xf32, #tpu.memory_space<vmem>>, %arg23: memref<1x32xf32, #tpu.memory_space<vmem>>, %arg24: memref<1x32xf32, #tpu.memory_space<vmem>>, %arg25: memref<32x16xbf16, #tpu.memory_space<vmem>>, %arg26: memref<1x16xf32, #tpu.memory_space<vmem>>, %arg27: memref<1x16xf32, #tpu.memory_space<vmem>>, %arg28: memref<1x1xf32, #tpu.memory_space<vmem>>, %arg29: memref<1x1x1xf32, #tpu.memory_space<vmem>>) attributes {dimension_semantics = [#tpu.dimension_semantics<parallel>], iteration_bounds = array<i64: 2>, scalar_prefetch = 0 : i64, scratch_operands = 0 : i64, tpu.core_type = #tpu.core_type<tc>, window_params = [{transform_indices = @transform_0, window_bounds = array<i64: 1, 8, 1>}, {transform_indices = @transform_1, window_bounds = array<i64: 1, 8, 2>}, {transform_indices = @transform_2, window_bounds = array<i64: 1, 1, 8>}, {transform_indices = @transform_3, window_bounds = array<i64: 1, 8, 1>}, {transform_indices = @transform_4, window_bounds = array<i64: 1, 1, 1>}, {pipeline_mode = #tpu.pipeline_mode<synchronous>, transform_indices = @transform_5, window_bounds = array<i64: 32, 32>}, {pipeline_mode = #tpu.pipeline_mode<synchronous>, transform_indices = @transform_6, window_bounds = array<i64: 2, 32>}, {pipeline_mode = #tpu.pipeline_mode<synchronous>, transform_indices = @transform_7, window_bounds = array<i64: 1, 32>}, {pipeline_mode = #tpu.pipeline_mode<synchronous>, transform_indices = @transform_8, window_bounds = array<i64: 32, 32>}, {pipeline_mode = #tpu.pipeline_mode<synchronous>, transform_indices = @transform_9, window_bounds = array<i64: 1, 32>}, {pipeline_mode = #tpu.pipeline_mode<synchronous>, transform_indices = @transform_10, window_bounds = array<i64: 2, 32, 96>}, {pipeline_mode = #tpu.pipeline_mode<synchronous>, transform_indices = @transform_11, window_bounds = array<i64: 2, 1, 96>}, {pipeline_mode = #tpu.pipeline_mode<synchronous>, transform_indices = @transform_12, window_bounds = array<i64: 2, 32, 32>}, {pipeline_mode = #tpu.pipeline_mode<synchronous>, transform_indices = @transform_13, window_bounds = array<i64: 2, 1, 32>}, {pipeline_mode = #tpu.pipeline_mode<synchronous>, transform_indices = @transform_14, window_bounds = array<i64: 2, 1, 32>}, {pipeline_mode = #tpu.pipeline_mode<synchronous>, transform_indices = @transform_15, window_bounds = array<i64: 2, 1, 32>}, {pipeline_mode = #tpu.pipeline_mode<synchronous>, transform_indices = @transform_16, window_bounds = array<i64: 2, 32, 64>}, {pipeline_mode = #tpu.pipeline_mode<synchronous>, transform_indices = @transform_17, window_bounds = array<i64: 2, 1, 64>}, {pipeline_mode = #tpu.pipeline_mode<synchronous>, transform_indices = @transform_18, window_bounds = array<i64: 2, 64, 32>}, {pipeline_mode = #tpu.pipeline_mode<synchronous>, transform_indices = @transform_19, window_bounds = array<i64: 2, 1, 32>}, {pipeline_mode = #tpu.pipeline_mode<synchronous>, transform_indices = @transform_20, window_bounds = array<i64: 2, 1, 32>}, {pipeline_mode = #tpu.pipeline_mode<synchronous>, transform_indices = @transform_21, window_bounds = array<i64: 2, 1, 32>}, {pipeline_mode = #tpu.pipeline_mode<synchronous>, transform_indices = @transform_22, window_bounds = array<i64: 1, 32>}, {pipeline_mode = #tpu.pipeline_mode<synchronous>, transform_indices = @transform_23, window_bounds = array<i64: 1, 32>}, {pipeline_mode = #tpu.pipeline_mode<synchronous>, transform_indices = @transform_24, window_bounds = array<i64: 32, 16>}, {pipeline_mode = #tpu.pipeline_mode<synchronous>, transform_indices = @transform_25, window_bounds = array<i64: 1, 16>}, {pipeline_mode = #tpu.pipeline_mode<synchronous>, transform_indices = @transform_26, window_bounds = array<i64: 1, 16>}, {pipeline_mode = #tpu.pipeline_mode<synchronous>, transform_indices = @transform_27, window_bounds = array<i64: 1, 1>}, {transform_indices = @transform_28, window_bounds = array<i64: 1, 1, 1>}]} {
    %c0 = arith.constant 0 : index
    %c0_0 = arith.constant 0 : index
    %c0_1 = arith.constant 0 : index
    %0 = vector.load %arg1[%c0, %c0_0, %c0_1] : memref<1x8x1xi32, #tpu.memory_space<vmem>>, vector<1x8x1xi32>
    %1 = vector.shape_cast %0 : vector<1x8x1xi32> to vector<8x1xi32>
    %2 = tpu.iota {dimensions = array<i32: 1>} : vector<8x32xi32>
    %3 = vector.broadcast %1 : vector<8x1xi32> to vector<8x32xi32>
    %4 = arith.cmpi eq, %3, %2 : vector<8x32xi32>
    %5 = arith.extui %4 : vector<8x32xi1> to vector<8x32xi32>
    %6 = arith.sitofp %5 : vector<8x32xi32> to vector<8x32xf32>
    %7 = arith.truncf %6 : vector<8x32xf32> to vector<8x32xbf16>
    %c0_2 = arith.constant 0 : index
    %c0_3 = arith.constant 0 : index
    %8 = vector.load %arg6[%c0_2, %c0_3] : memref<32x32xbf16, #tpu.memory_space<vmem>>, vector<32x32xbf16>
    %cst = arith.constant dense<0.000000e+00> : vector<8x32xf32>
    %9 = tpu.matmul %7, %8, %cst {dimension_numbers = #tpu.dot_dimension_numbers<[1], [0], [0], [1], [0, 0, 1, 1], [], []>} : vector<8x32xbf16>, vector<32x32xbf16>, vector<8x32xf32> -> vector<8x32xf32>
    %c0_4 = arith.constant 0 : index
    %c0_5 = arith.constant 0 : index
    %c0_6 = arith.constant 0 : index
    %10 = vector.load %arg2[%c0_4, %c0_5, %c0_6] : memref<1x8x2xf32, #tpu.memory_space<vmem>>, vector<1x8x2xf32>
    %11 = vector.extract_strided_slice %10 {offsets = [0, 0, 0], sizes = [1, 8, 1], strides = [1, 1, 1]} : vector<1x8x2xf32> to vector<1x8x1xf32>
    %12 = vector.shape_cast %11 : vector<1x8x1xf32> to vector<8x1xf32>
    %13 = vector.extract_strided_slice %10 {offsets = [0, 0, 1], sizes = [1, 8, 1], strides = [1, 1, 1]} : vector<1x8x2xf32> to vector<1x8x1xf32>
    %14 = vector.shape_cast %13 : vector<1x8x1xf32> to vector<8x1xf32>
    %c0_7 = arith.constant 0 : index
    %c0_8 = arith.constant 0 : index
    %15 = vector.load %arg7[%c0_7, %c0_8] : memref<2x32xf32, #tpu.memory_space<vmem>>, vector<2x32xf32>
    %16 = vector.extract_strided_slice %15 {offsets = [0, 0], sizes = [1, 32], strides = [1, 1]} : vector<2x32xf32> to vector<1x32xf32>
    %17 = vector.broadcast %12 : vector<8x1xf32> to vector<8x32xf32>
    %18 = vector.broadcast %16 : vector<1x32xf32> to vector<8x32xf32>
    %19 = arith.mulf %17, %18 : vector<8x32xf32>
    %20 = vector.extract_strided_slice %15 {offsets = [1, 0], sizes = [1, 32], strides = [1, 1]} : vector<2x32xf32> to vector<1x32xf32>
    %21 = vector.broadcast %14 : vector<8x1xf32> to vector<8x32xf32>
    %22 = vector.broadcast %20 : vector<1x32xf32> to vector<8x32xf32>
    %23 = arith.mulf %21, %22 : vector<8x32xf32>
    %24 = arith.addf %19, %23 : vector<8x32xf32>
    %c0_9 = arith.constant 0 : index
    %c0_10 = arith.constant 0 : index
    %25 = vector.load %arg8[%c0_9, %c0_10] : memref<1x32xf32, #tpu.memory_space<vmem>>, vector<1x32xf32>
    %26 = vector.broadcast %25 : vector<1x32xf32> to vector<8x32xf32>
    %27 = arith.addf %24, %26 : vector<8x32xf32>
    %cst_11 = arith.constant 0.000000e+00 : f32
    %28 = vector.broadcast %cst_11 : f32 to vector<8x32xf32>
    %29 = arith.maximumf %27, %28 : vector<8x32xf32>
    %30 = arith.truncf %29 : vector<8x32xf32> to vector<8x32xbf16>
    %c0_12 = arith.constant 0 : index
    %c0_13 = arith.constant 0 : index
    %31 = vector.load %arg9[%c0_12, %c0_13] : memref<32x32xbf16, #tpu.memory_space<vmem>>, vector<32x32xbf16>
    %cst_14 = arith.constant dense<0.000000e+00> : vector<8x32xf32>
    %32 = tpu.matmul %30, %31, %cst_14 {dimension_numbers = #tpu.dot_dimension_numbers<[1], [0], [0], [1], [0, 0, 1, 1], [], []>} : vector<8x32xbf16>, vector<32x32xbf16>, vector<8x32xf32> -> vector<8x32xf32>
    %c0_15 = arith.constant 0 : index
    %c0_16 = arith.constant 0 : index
    %33 = vector.load %arg10[%c0_15, %c0_16] : memref<1x32xf32, #tpu.memory_space<vmem>>, vector<1x32xf32>
    %34 = vector.broadcast %33 : vector<1x32xf32> to vector<8x32xf32>
    %35 = arith.addf %32, %34 : vector<8x32xf32>
    %36 = arith.addf %9, %35 : vector<8x32xf32>
    %c0_17 = arith.constant 0 : index
    %c0_18 = arith.constant 0 : index
    %c0_19 = arith.constant 0 : index
    %37 = vector.load %arg3[%c0_17, %c0_18, %c0_19] : memref<1x1x8xf32, #tpu.memory_space<vmem>>, vector<1x1x8xf32>
    %cst_20 = arith.constant 1.000000e+00 : f32
    %38 = vector.broadcast %cst_20 : f32 to vector<1x1x8xf32>
    %39 = arith.subf %37, %38 : vector<1x1x8xf32>
    %cst_21 = arith.constant 1.000000e+30 : f32
    %40 = vector.broadcast %cst_21 : f32 to vector<1x1x8xf32>
    %41 = arith.mulf %39, %40 : vector<1x1x8xf32>
    %42 = tpu.concatenate %41, %41, %41, %41 in 0 : vector<1x1x8xf32>, vector<1x1x8xf32>, vector<1x1x8xf32>, vector<1x1x8xf32> -> vector<4x1x8xf32>
    %43 = arith.truncf %36 : vector<8x32xf32> to vector<8x32xbf16>
    %c0_22 = arith.constant 0 : index
    %c0_23 = arith.constant 0 : index
    %c0_24 = arith.constant 0 : index
    %44 = vector.load %arg11[%c0_22, %c0_23, %c0_24] : memref<2x32x96xbf16, #tpu.memory_space<vmem>>, vector<1x32x96xbf16>
    %45 = vector.shape_cast %44 : vector<1x32x96xbf16> to vector<32x96xbf16>
    %cst_25 = arith.constant dense<0.000000e+00> : vector<8x96xf32>
    %46 = tpu.matmul %43, %45, %cst_25 {dimension_numbers = #tpu.dot_dimension_numbers<[1], [0], [0], [1], [0, 0, 1, 1], [], []>} : vector<8x32xbf16>, vector<32x96xbf16>, vector<8x96xf32> -> vector<8x96xf32>
    %c0_26 = arith.constant 0 : index
    %c0_27 = arith.constant 0 : index
    %c0_28 = arith.constant 0 : index
    %47 = vector.load %arg12[%c0_26, %c0_27, %c0_28] : memref<2x1x96xf32, #tpu.memory_space<vmem>>, vector<1x1x96xf32>
    %48 = vector.shape_cast %47 : vector<1x1x96xf32> to vector<1x96xf32>
    %49 = vector.broadcast %48 : vector<1x96xf32> to vector<8x96xf32>
    %50 = arith.addf %46, %49 : vector<8x96xf32>
    %51 = arith.truncf %50 : vector<8x96xf32> to vector<8x96xbf16>
    %52 = vector.shape_cast %51 : vector<8x96xbf16> to vector<1x8x96xbf16>
    %53 = vector.extract_strided_slice %52 {offsets = [0, 0, 0], sizes = [1, 8, 8], strides = [1, 1, 1]} : vector<1x8x96xbf16> to vector<1x8x8xbf16>
    %54 = vector.extract_strided_slice %52 {offsets = [0, 0, 8], sizes = [1, 8, 8], strides = [1, 1, 1]} : vector<1x8x96xbf16> to vector<1x8x8xbf16>
    %55 = vector.extract_strided_slice %52 {offsets = [0, 0, 16], sizes = [1, 8, 8], strides = [1, 1, 1]} : vector<1x8x96xbf16> to vector<1x8x8xbf16>
    %56 = vector.extract_strided_slice %52 {offsets = [0, 0, 24], sizes = [1, 8, 8], strides = [1, 1, 1]} : vector<1x8x96xbf16> to vector<1x8x8xbf16>
    %57 = tpu.concatenate %53, %54, %55, %56 in 0 : vector<1x8x8xbf16>, vector<1x8x8xbf16>, vector<1x8x8xbf16>, vector<1x8x8xbf16> -> vector<4x8x8xbf16>
    %58 = vector.extract_strided_slice %52 {offsets = [0, 0, 32], sizes = [1, 8, 8], strides = [1, 1, 1]} : vector<1x8x96xbf16> to vector<1x8x8xbf16>
    %59 = vector.extract_strided_slice %52 {offsets = [0, 0, 40], sizes = [1, 8, 8], strides = [1, 1, 1]} : vector<1x8x96xbf16> to vector<1x8x8xbf16>
    %60 = vector.extract_strided_slice %52 {offsets = [0, 0, 48], sizes = [1, 8, 8], strides = [1, 1, 1]} : vector<1x8x96xbf16> to vector<1x8x8xbf16>
    %61 = vector.extract_strided_slice %52 {offsets = [0, 0, 56], sizes = [1, 8, 8], strides = [1, 1, 1]} : vector<1x8x96xbf16> to vector<1x8x8xbf16>
    %62 = tpu.concatenate %58, %59, %60, %61 in 0 : vector<1x8x8xbf16>, vector<1x8x8xbf16>, vector<1x8x8xbf16>, vector<1x8x8xbf16> -> vector<4x8x8xbf16>
    %63 = vector.extract_strided_slice %52 {offsets = [0, 0, 64], sizes = [1, 8, 8], strides = [1, 1, 1]} : vector<1x8x96xbf16> to vector<1x8x8xbf16>
    %64 = vector.extract_strided_slice %52 {offsets = [0, 0, 72], sizes = [1, 8, 8], strides = [1, 1, 1]} : vector<1x8x96xbf16> to vector<1x8x8xbf16>
    %65 = vector.extract_strided_slice %52 {offsets = [0, 0, 80], sizes = [1, 8, 8], strides = [1, 1, 1]} : vector<1x8x96xbf16> to vector<1x8x8xbf16>
    %66 = vector.extract_strided_slice %52 {offsets = [0, 0, 88], sizes = [1, 8, 8], strides = [1, 1, 1]} : vector<1x8x96xbf16> to vector<1x8x8xbf16>
    %67 = tpu.concatenate %63, %64, %65, %66 in 0 : vector<1x8x8xbf16>, vector<1x8x8xbf16>, vector<1x8x8xbf16>, vector<1x8x8xbf16> -> vector<4x8x8xbf16>
    "tpu.trace_start"() <{level = 10 : i32, message = "bqd,bkd->bqk"}> : () -> ()
    %cst_29 = arith.constant dense<0.000000e+00> : vector<4x8x8xf32>
    %68 = tpu.matmul %57, %62, %cst_29 {dimension_numbers = #tpu.dot_dimension_numbers<[2], [2], [1], [1], [0, 0, 0, 1, 1, 1], [0], [0]>} : vector<4x8x8xbf16>, vector<4x8x8xbf16>, vector<4x8x8xf32> -> vector<4x8x8xf32>
    "tpu.trace_stop"() : () -> ()
    %cst_30 = arith.constant 0.353553385 : f32
    %69 = vector.broadcast %cst_30 : f32 to vector<4x8x8xf32>
    %70 = arith.mulf %68, %69 : vector<4x8x8xf32>
    %71 = vector.broadcast %42 : vector<4x1x8xf32> to vector<4x8x8xf32>
    %72 = arith.addf %70, %71 : vector<4x8x8xf32>
    %cst_31 = arith.constant dense<0xFF800000> : vector<4x8xf32>
    %73 = vector.multi_reduction <maximumf>, %72, %cst_31 [2] : vector<4x8x8xf32> to vector<4x8xf32>
    %74 = vector.shape_cast %73 : vector<4x8xf32> to vector<4x8x1xf32>
    %75 = vector.broadcast %74 : vector<4x8x1xf32> to vector<4x8x8xf32>
    %76 = arith.subf %72, %75 : vector<4x8x8xf32>
    %77 = math.exp %76 : vector<4x8x8xf32>
    %cst_32 = arith.constant dense<0.000000e+00> : vector<4x8xf32>
    %78 = vector.multi_reduction <add>, %77, %cst_32 [2] : vector<4x8x8xf32> to vector<4x8xf32>
    %79 = vector.shape_cast %78 : vector<4x8xf32> to vector<4x8x1xf32>
    %80 = tpu.reciprocal %79 {approx = true} : vector<4x8x1xf32> -> vector<4x8x1xf32>
    %81 = vector.broadcast %80 : vector<4x8x1xf32> to vector<4x8x8xf32>
    %82 = arith.mulf %77, %81 : vector<4x8x8xf32>
    %83 = arith.truncf %82 : vector<4x8x8xf32> to vector<4x8x8xbf16>
    "tpu.trace_start"() <{level = 10 : i32, message = "bqk,bkd->bqd"}> : () -> ()
    %cst_33 = arith.constant dense<0.000000e+00> : vector<4x8x8xf32>
    %84 = tpu.matmul %83, %67, %cst_33 {dimension_numbers = #tpu.dot_dimension_numbers<[2], [1], [1], [2], [0, 0, 0, 1, 1, 2], [0], [0]>} : vector<4x8x8xbf16>, vector<4x8x8xbf16>, vector<4x8x8xf32> -> vector<4x8x8xf32>
    "tpu.trace_stop"() : () -> ()
    %85 = vector.extract_strided_slice %84 {offsets = [0, 0, 0], sizes = [1, 8, 8], strides = [1, 1, 1]} : vector<4x8x8xf32> to vector<1x8x8xf32>
    %86 = vector.extract_strided_slice %84 {offsets = [1, 0, 0], sizes = [1, 8, 8], strides = [1, 1, 1]} : vector<4x8x8xf32> to vector<1x8x8xf32>
    %87 = vector.extract_strided_slice %84 {offsets = [2, 0, 0], sizes = [1, 8, 8], strides = [1, 1, 1]} : vector<4x8x8xf32> to vector<1x8x8xf32>
    %88 = vector.extract_strided_slice %84 {offsets = [3, 0, 0], sizes = [1, 8, 8], strides = [1, 1, 1]} : vector<4x8x8xf32> to vector<1x8x8xf32>
    %89 = tpu.concatenate %85, %86, %87, %88 in 2 : vector<1x8x8xf32>, vector<1x8x8xf32>, vector<1x8x8xf32>, vector<1x8x8xf32> -> vector<1x8x32xf32>
    %90 = vector.shape_cast %89 : vector<1x8x32xf32> to vector<8x32xf32>
    %91 = arith.truncf %90 : vector<8x32xf32> to vector<8x32xbf16>
    %c0_34 = arith.constant 0 : index
    %c0_35 = arith.constant 0 : index
    %c0_36 = arith.constant 0 : index
    %92 = vector.load %arg13[%c0_34, %c0_35, %c0_36] : memref<2x32x32xbf16, #tpu.memory_space<vmem>>, vector<1x32x32xbf16>
    %93 = vector.shape_cast %92 : vector<1x32x32xbf16> to vector<32x32xbf16>
    %cst_37 = arith.constant dense<0.000000e+00> : vector<8x32xf32>
    %94 = tpu.matmul %91, %93, %cst_37 {dimension_numbers = #tpu.dot_dimension_numbers<[1], [0], [0], [1], [0, 0, 1, 1], [], []>} : vector<8x32xbf16>, vector<32x32xbf16>, vector<8x32xf32> -> vector<8x32xf32>
    %c0_38 = arith.constant 0 : index
    %c0_39 = arith.constant 0 : index
    %c0_40 = arith.constant 0 : index
    %95 = vector.load %arg14[%c0_38, %c0_39, %c0_40] : memref<2x1x32xf32, #tpu.memory_space<vmem>>, vector<1x1x32xf32>
    %96 = vector.shape_cast %95 : vector<1x1x32xf32> to vector<1x32xf32>
    %97 = vector.broadcast %96 : vector<1x32xf32> to vector<8x32xf32>
    %98 = arith.addf %94, %97 : vector<8x32xf32>
    %99 = arith.addf %36, %98 : vector<8x32xf32>
    %c0_41 = arith.constant 0 : index
    %c0_42 = arith.constant 0 : index
    %c0_43 = arith.constant 0 : index
    %100 = vector.load %arg15[%c0_41, %c0_42, %c0_43] : memref<2x1x32xf32, #tpu.memory_space<vmem>>, vector<1x1x32xf32>
    %101 = vector.shape_cast %100 : vector<1x1x32xf32> to vector<1x32xf32>
    %c0_44 = arith.constant 0 : index
    %c0_45 = arith.constant 0 : index
    %c0_46 = arith.constant 0 : index
    %102 = vector.load %arg16[%c0_44, %c0_45, %c0_46] : memref<2x1x32xf32, #tpu.memory_space<vmem>>, vector<1x1x32xf32>
    %103 = vector.shape_cast %102 : vector<1x1x32xf32> to vector<1x32xf32>
    %cst_47 = arith.constant dense<0.000000e+00> : vector<8xf32>
    %104 = vector.multi_reduction <add>, %99, %cst_47 [1] : vector<8x32xf32> to vector<8xf32>
    %105 = vector.shape_cast %104 : vector<8xf32> to vector<8x1xf32>
    %cst_48 = arith.constant 3.200000e+01 : f32
    %106 = vector.broadcast %cst_48 : f32 to vector<8x1xf32>
    %107 = arith.divf %105, %106 : vector<8x1xf32>
    %108 = vector.broadcast %107 : vector<8x1xf32> to vector<8x32xf32>
    %109 = arith.subf %99, %108 : vector<8x32xf32>
    %110 = arith.mulf %109, %109 : vector<8x32xf32>
    %cst_49 = arith.constant dense<0.000000e+00> : vector<8xf32>
    %111 = vector.multi_reduction <add>, %110, %cst_49 [1] : vector<8x32xf32> to vector<8xf32>
    %112 = vector.shape_cast %111 : vector<8xf32> to vector<8x1xf32>
    %cst_50 = arith.constant 3.200000e+01 : f32
    %113 = vector.broadcast %cst_50 : f32 to vector<8x1xf32>
    %114 = arith.divf %112, %113 : vector<8x1xf32>
    %cst_51 = arith.constant 9.99999974E-6 : f32
    %115 = vector.broadcast %cst_51 : f32 to vector<8x1xf32>
    %116 = arith.addf %114, %115 : vector<8x1xf32>
    %117 = math.rsqrt %116 : vector<8x1xf32>
    %118 = vector.broadcast %117 : vector<8x1xf32> to vector<8x32xf32>
    %119 = arith.mulf %109, %118 : vector<8x32xf32>
    %120 = vector.broadcast %101 : vector<1x32xf32> to vector<8x32xf32>
    %121 = arith.mulf %119, %120 : vector<8x32xf32>
    %122 = vector.broadcast %103 : vector<1x32xf32> to vector<8x32xf32>
    %123 = arith.addf %121, %122 : vector<8x32xf32>
    %124 = arith.truncf %123 : vector<8x32xf32> to vector<8x32xbf16>
    %c0_52 = arith.constant 0 : index
    %c0_53 = arith.constant 0 : index
    %c0_54 = arith.constant 0 : index
    %125 = vector.load %arg17[%c0_52, %c0_53, %c0_54] : memref<2x32x64xbf16, #tpu.memory_space<vmem>>, vector<1x32x64xbf16>
    %126 = vector.shape_cast %125 : vector<1x32x64xbf16> to vector<32x64xbf16>
    %cst_55 = arith.constant dense<0.000000e+00> : vector<8x64xf32>
    %127 = tpu.matmul %124, %126, %cst_55 {dimension_numbers = #tpu.dot_dimension_numbers<[1], [0], [0], [1], [0, 0, 1, 1], [], []>} : vector<8x32xbf16>, vector<32x64xbf16>, vector<8x64xf32> -> vector<8x64xf32>
    %c0_56 = arith.constant 0 : index
    %c0_57 = arith.constant 0 : index
    %c0_58 = arith.constant 0 : index
    %128 = vector.load %arg18[%c0_56, %c0_57, %c0_58] : memref<2x1x64xf32, #tpu.memory_space<vmem>>, vector<1x1x64xf32>
    %129 = vector.shape_cast %128 : vector<1x1x64xf32> to vector<1x64xf32>
    %130 = vector.broadcast %129 : vector<1x64xf32> to vector<8x64xf32>
    %131 = arith.addf %127, %130 : vector<8x64xf32>
    %cst_59 = arith.constant 0.000000e+00 : f32
    %132 = vector.broadcast %cst_59 : f32 to vector<8x64xf32>
    %133 = arith.maximumf %131, %132 : vector<8x64xf32>
    %134 = arith.truncf %133 : vector<8x64xf32> to vector<8x64xbf16>
    %c0_60 = arith.constant 0 : index
    %c0_61 = arith.constant 0 : index
    %c0_62 = arith.constant 0 : index
    %135 = vector.load %arg19[%c0_60, %c0_61, %c0_62] : memref<2x64x32xbf16, #tpu.memory_space<vmem>>, vector<1x64x32xbf16>
    %136 = vector.shape_cast %135 : vector<1x64x32xbf16> to vector<64x32xbf16>
    %cst_63 = arith.constant dense<0.000000e+00> : vector<8x32xf32>
    %137 = tpu.matmul %134, %136, %cst_63 {dimension_numbers = #tpu.dot_dimension_numbers<[1], [0], [0], [1], [0, 0, 1, 1], [], []>} : vector<8x64xbf16>, vector<64x32xbf16>, vector<8x32xf32> -> vector<8x32xf32>
    %c0_64 = arith.constant 0 : index
    %c0_65 = arith.constant 0 : index
    %c0_66 = arith.constant 0 : index
    %138 = vector.load %arg20[%c0_64, %c0_65, %c0_66] : memref<2x1x32xf32, #tpu.memory_space<vmem>>, vector<1x1x32xf32>
    %139 = vector.shape_cast %138 : vector<1x1x32xf32> to vector<1x32xf32>
    %140 = vector.broadcast %139 : vector<1x32xf32> to vector<8x32xf32>
    %141 = arith.addf %137, %140 : vector<8x32xf32>
    %142 = arith.addf %123, %141 : vector<8x32xf32>
    %c0_67 = arith.constant 0 : index
    %c0_68 = arith.constant 0 : index
    %c0_69 = arith.constant 0 : index
    %143 = vector.load %arg21[%c0_67, %c0_68, %c0_69] : memref<2x1x32xf32, #tpu.memory_space<vmem>>, vector<1x1x32xf32>
    %144 = vector.shape_cast %143 : vector<1x1x32xf32> to vector<1x32xf32>
    %c0_70 = arith.constant 0 : index
    %c0_71 = arith.constant 0 : index
    %c0_72 = arith.constant 0 : index
    %145 = vector.load %arg22[%c0_70, %c0_71, %c0_72] : memref<2x1x32xf32, #tpu.memory_space<vmem>>, vector<1x1x32xf32>
    %146 = vector.shape_cast %145 : vector<1x1x32xf32> to vector<1x32xf32>
    %cst_73 = arith.constant dense<0.000000e+00> : vector<8xf32>
    %147 = vector.multi_reduction <add>, %142, %cst_73 [1] : vector<8x32xf32> to vector<8xf32>
    %148 = vector.shape_cast %147 : vector<8xf32> to vector<8x1xf32>
    %cst_74 = arith.constant 3.200000e+01 : f32
    %149 = vector.broadcast %cst_74 : f32 to vector<8x1xf32>
    %150 = arith.divf %148, %149 : vector<8x1xf32>
    %151 = vector.broadcast %150 : vector<8x1xf32> to vector<8x32xf32>
    %152 = arith.subf %142, %151 : vector<8x32xf32>
    %153 = arith.mulf %152, %152 : vector<8x32xf32>
    %cst_75 = arith.constant dense<0.000000e+00> : vector<8xf32>
    %154 = vector.multi_reduction <add>, %153, %cst_75 [1] : vector<8x32xf32> to vector<8xf32>
    %155 = vector.shape_cast %154 : vector<8xf32> to vector<8x1xf32>
    %cst_76 = arith.constant 3.200000e+01 : f32
    %156 = vector.broadcast %cst_76 : f32 to vector<8x1xf32>
    %157 = arith.divf %155, %156 : vector<8x1xf32>
    %cst_77 = arith.constant 9.99999974E-6 : f32
    %158 = vector.broadcast %cst_77 : f32 to vector<8x1xf32>
    %159 = arith.addf %157, %158 : vector<8x1xf32>
    %160 = math.rsqrt %159 : vector<8x1xf32>
    %161 = vector.broadcast %160 : vector<8x1xf32> to vector<8x32xf32>
    %162 = arith.mulf %152, %161 : vector<8x32xf32>
    %163 = vector.broadcast %144 : vector<1x32xf32> to vector<8x32xf32>
    %164 = arith.mulf %162, %163 : vector<8x32xf32>
    %165 = vector.broadcast %146 : vector<1x32xf32> to vector<8x32xf32>
    %166 = arith.addf %164, %165 : vector<8x32xf32>
    %167 = arith.truncf %166 : vector<8x32xf32> to vector<8x32xbf16>
    %c1 = arith.constant 1 : index
    %c0_78 = arith.constant 0 : index
    %c0_79 = arith.constant 0 : index
    %168 = vector.load %arg11[%c1, %c0_78, %c0_79] : memref<2x32x96xbf16, #tpu.memory_space<vmem>>, vector<1x32x96xbf16>
    %169 = vector.shape_cast %168 : vector<1x32x96xbf16> to vector<32x96xbf16>
    %cst_80 = arith.constant dense<0.000000e+00> : vector<8x96xf32>
    %170 = tpu.matmul %167, %169, %cst_80 {dimension_numbers = #tpu.dot_dimension_numbers<[1], [0], [0], [1], [0, 0, 1, 1], [], []>} : vector<8x32xbf16>, vector<32x96xbf16>, vector<8x96xf32> -> vector<8x96xf32>
    %c1_81 = arith.constant 1 : index
    %c0_82 = arith.constant 0 : index
    %c0_83 = arith.constant 0 : index
    %171 = vector.load %arg12[%c1_81, %c0_82, %c0_83] : memref<2x1x96xf32, #tpu.memory_space<vmem>>, vector<1x1x96xf32>
    %172 = vector.shape_cast %171 : vector<1x1x96xf32> to vector<1x96xf32>
    %173 = vector.broadcast %172 : vector<1x96xf32> to vector<8x96xf32>
    %174 = arith.addf %170, %173 : vector<8x96xf32>
    %175 = arith.truncf %174 : vector<8x96xf32> to vector<8x96xbf16>
    %176 = vector.shape_cast %175 : vector<8x96xbf16> to vector<1x8x96xbf16>
    %177 = vector.extract_strided_slice %176 {offsets = [0, 0, 0], sizes = [1, 8, 8], strides = [1, 1, 1]} : vector<1x8x96xbf16> to vector<1x8x8xbf16>
    %178 = vector.extract_strided_slice %176 {offsets = [0, 0, 8], sizes = [1, 8, 8], strides = [1, 1, 1]} : vector<1x8x96xbf16> to vector<1x8x8xbf16>
    %179 = vector.extract_strided_slice %176 {offsets = [0, 0, 16], sizes = [1, 8, 8], strides = [1, 1, 1]} : vector<1x8x96xbf16> to vector<1x8x8xbf16>
    %180 = vector.extract_strided_slice %176 {offsets = [0, 0, 24], sizes = [1, 8, 8], strides = [1, 1, 1]} : vector<1x8x96xbf16> to vector<1x8x8xbf16>
    %181 = tpu.concatenate %177, %178, %179, %180 in 0 : vector<1x8x8xbf16>, vector<1x8x8xbf16>, vector<1x8x8xbf16>, vector<1x8x8xbf16> -> vector<4x8x8xbf16>
    %182 = vector.extract_strided_slice %176 {offsets = [0, 0, 32], sizes = [1, 8, 8], strides = [1, 1, 1]} : vector<1x8x96xbf16> to vector<1x8x8xbf16>
    %183 = vector.extract_strided_slice %176 {offsets = [0, 0, 40], sizes = [1, 8, 8], strides = [1, 1, 1]} : vector<1x8x96xbf16> to vector<1x8x8xbf16>
    %184 = vector.extract_strided_slice %176 {offsets = [0, 0, 48], sizes = [1, 8, 8], strides = [1, 1, 1]} : vector<1x8x96xbf16> to vector<1x8x8xbf16>
    %185 = vector.extract_strided_slice %176 {offsets = [0, 0, 56], sizes = [1, 8, 8], strides = [1, 1, 1]} : vector<1x8x96xbf16> to vector<1x8x8xbf16>
    %186 = tpu.concatenate %182, %183, %184, %185 in 0 : vector<1x8x8xbf16>, vector<1x8x8xbf16>, vector<1x8x8xbf16>, vector<1x8x8xbf16> -> vector<4x8x8xbf16>
    %187 = vector.extract_strided_slice %176 {offsets = [0, 0, 64], sizes = [1, 8, 8], strides = [1, 1, 1]} : vector<1x8x96xbf16> to vector<1x8x8xbf16>
    %188 = vector.extract_strided_slice %176 {offsets = [0, 0, 72], sizes = [1, 8, 8], strides = [1, 1, 1]} : vector<1x8x96xbf16> to vector<1x8x8xbf16>
    %189 = vector.extract_strided_slice %176 {offsets = [0, 0, 80], sizes = [1, 8, 8], strides = [1, 1, 1]} : vector<1x8x96xbf16> to vector<1x8x8xbf16>
    %190 = vector.extract_strided_slice %176 {offsets = [0, 0, 88], sizes = [1, 8, 8], strides = [1, 1, 1]} : vector<1x8x96xbf16> to vector<1x8x8xbf16>
    %191 = tpu.concatenate %187, %188, %189, %190 in 0 : vector<1x8x8xbf16>, vector<1x8x8xbf16>, vector<1x8x8xbf16>, vector<1x8x8xbf16> -> vector<4x8x8xbf16>
    "tpu.trace_start"() <{level = 10 : i32, message = "bqd,bkd->bqk"}> : () -> ()
    %cst_84 = arith.constant dense<0.000000e+00> : vector<4x8x8xf32>
    %192 = tpu.matmul %181, %186, %cst_84 {dimension_numbers = #tpu.dot_dimension_numbers<[2], [2], [1], [1], [0, 0, 0, 1, 1, 1], [0], [0]>} : vector<4x8x8xbf16>, vector<4x8x8xbf16>, vector<4x8x8xf32> -> vector<4x8x8xf32>
    "tpu.trace_stop"() : () -> ()
    %cst_85 = arith.constant 0.353553385 : f32
    %193 = vector.broadcast %cst_85 : f32 to vector<4x8x8xf32>
    %194 = arith.mulf %192, %193 : vector<4x8x8xf32>
    %195 = vector.broadcast %42 : vector<4x1x8xf32> to vector<4x8x8xf32>
    %196 = arith.addf %194, %195 : vector<4x8x8xf32>
    %cst_86 = arith.constant dense<0xFF800000> : vector<4x8xf32>
    %197 = vector.multi_reduction <maximumf>, %196, %cst_86 [2] : vector<4x8x8xf32> to vector<4x8xf32>
    %198 = vector.shape_cast %197 : vector<4x8xf32> to vector<4x8x1xf32>
    %199 = vector.broadcast %198 : vector<4x8x1xf32> to vector<4x8x8xf32>
    %200 = arith.subf %196, %199 : vector<4x8x8xf32>
    %201 = math.exp %200 : vector<4x8x8xf32>
    %cst_87 = arith.constant dense<0.000000e+00> : vector<4x8xf32>
    %202 = vector.multi_reduction <add>, %201, %cst_87 [2] : vector<4x8x8xf32> to vector<4x8xf32>
    %203 = vector.shape_cast %202 : vector<4x8xf32> to vector<4x8x1xf32>
    %204 = tpu.reciprocal %203 {approx = true} : vector<4x8x1xf32> -> vector<4x8x1xf32>
    %205 = vector.broadcast %204 : vector<4x8x1xf32> to vector<4x8x8xf32>
    %206 = arith.mulf %201, %205 : vector<4x8x8xf32>
    %207 = arith.truncf %206 : vector<4x8x8xf32> to vector<4x8x8xbf16>
    "tpu.trace_start"() <{level = 10 : i32, message = "bqk,bkd->bqd"}> : () -> ()
    %cst_88 = arith.constant dense<0.000000e+00> : vector<4x8x8xf32>
    %208 = tpu.matmul %207, %191, %cst_88 {dimension_numbers = #tpu.dot_dimension_numbers<[2], [1], [1], [2], [0, 0, 0, 1, 1, 2], [0], [0]>} : vector<4x8x8xbf16>, vector<4x8x8xbf16>, vector<4x8x8xf32> -> vector<4x8x8xf32>
    "tpu.trace_stop"() : () -> ()
    %209 = vector.extract_strided_slice %208 {offsets = [0, 0, 0], sizes = [1, 8, 8], strides = [1, 1, 1]} : vector<4x8x8xf32> to vector<1x8x8xf32>
    %210 = vector.extract_strided_slice %208 {offsets = [1, 0, 0], sizes = [1, 8, 8], strides = [1, 1, 1]} : vector<4x8x8xf32> to vector<1x8x8xf32>
    %211 = vector.extract_strided_slice %208 {offsets = [2, 0, 0], sizes = [1, 8, 8], strides = [1, 1, 1]} : vector<4x8x8xf32> to vector<1x8x8xf32>
    %212 = vector.extract_strided_slice %208 {offsets = [3, 0, 0], sizes = [1, 8, 8], strides = [1, 1, 1]} : vector<4x8x8xf32> to vector<1x8x8xf32>
    %213 = tpu.concatenate %209, %210, %211, %212 in 2 : vector<1x8x8xf32>, vector<1x8x8xf32>, vector<1x8x8xf32>, vector<1x8x8xf32> -> vector<1x8x32xf32>
    %214 = vector.shape_cast %213 : vector<1x8x32xf32> to vector<8x32xf32>
    %215 = arith.truncf %214 : vector<8x32xf32> to vector<8x32xbf16>
    %c1_89 = arith.constant 1 : index
    %c0_90 = arith.constant 0 : index
    %c0_91 = arith.constant 0 : index
    %216 = vector.load %arg13[%c1_89, %c0_90, %c0_91] : memref<2x32x32xbf16, #tpu.memory_space<vmem>>, vector<1x32x32xbf16>
    %217 = vector.shape_cast %216 : vector<1x32x32xbf16> to vector<32x32xbf16>
    %cst_92 = arith.constant dense<0.000000e+00> : vector<8x32xf32>
    %218 = tpu.matmul %215, %217, %cst_92 {dimension_numbers = #tpu.dot_dimension_numbers<[1], [0], [0], [1], [0, 0, 1, 1], [], []>} : vector<8x32xbf16>, vector<32x32xbf16>, vector<8x32xf32> -> vector<8x32xf32>
    %c1_93 = arith.constant 1 : index
    %c0_94 = arith.constant 0 : index
    %c0_95 = arith.constant 0 : index
    %219 = vector.load %arg14[%c1_93, %c0_94, %c0_95] : memref<2x1x32xf32, #tpu.memory_space<vmem>>, vector<1x1x32xf32>
    %220 = vector.shape_cast %219 : vector<1x1x32xf32> to vector<1x32xf32>
    %221 = vector.broadcast %220 : vector<1x32xf32> to vector<8x32xf32>
    %222 = arith.addf %218, %221 : vector<8x32xf32>
    %223 = arith.addf %166, %222 : vector<8x32xf32>
    %c1_96 = arith.constant 1 : index
    %c0_97 = arith.constant 0 : index
    %c0_98 = arith.constant 0 : index
    %224 = vector.load %arg15[%c1_96, %c0_97, %c0_98] : memref<2x1x32xf32, #tpu.memory_space<vmem>>, vector<1x1x32xf32>
    %225 = vector.shape_cast %224 : vector<1x1x32xf32> to vector<1x32xf32>
    %c1_99 = arith.constant 1 : index
    %c0_100 = arith.constant 0 : index
    %c0_101 = arith.constant 0 : index
    %226 = vector.load %arg16[%c1_99, %c0_100, %c0_101] : memref<2x1x32xf32, #tpu.memory_space<vmem>>, vector<1x1x32xf32>
    %227 = vector.shape_cast %226 : vector<1x1x32xf32> to vector<1x32xf32>
    %cst_102 = arith.constant dense<0.000000e+00> : vector<8xf32>
    %228 = vector.multi_reduction <add>, %223, %cst_102 [1] : vector<8x32xf32> to vector<8xf32>
    %229 = vector.shape_cast %228 : vector<8xf32> to vector<8x1xf32>
    %cst_103 = arith.constant 3.200000e+01 : f32
    %230 = vector.broadcast %cst_103 : f32 to vector<8x1xf32>
    %231 = arith.divf %229, %230 : vector<8x1xf32>
    %232 = vector.broadcast %231 : vector<8x1xf32> to vector<8x32xf32>
    %233 = arith.subf %223, %232 : vector<8x32xf32>
    %234 = arith.mulf %233, %233 : vector<8x32xf32>
    %cst_104 = arith.constant dense<0.000000e+00> : vector<8xf32>
    %235 = vector.multi_reduction <add>, %234, %cst_104 [1] : vector<8x32xf32> to vector<8xf32>
    %236 = vector.shape_cast %235 : vector<8xf32> to vector<8x1xf32>
    %cst_105 = arith.constant 3.200000e+01 : f32
    %237 = vector.broadcast %cst_105 : f32 to vector<8x1xf32>
    %238 = arith.divf %236, %237 : vector<8x1xf32>
    %cst_106 = arith.constant 9.99999974E-6 : f32
    %239 = vector.broadcast %cst_106 : f32 to vector<8x1xf32>
    %240 = arith.addf %238, %239 : vector<8x1xf32>
    %241 = math.rsqrt %240 : vector<8x1xf32>
    %242 = vector.broadcast %241 : vector<8x1xf32> to vector<8x32xf32>
    %243 = arith.mulf %233, %242 : vector<8x32xf32>
    %244 = vector.broadcast %225 : vector<1x32xf32> to vector<8x32xf32>
    %245 = arith.mulf %243, %244 : vector<8x32xf32>
    %246 = vector.broadcast %227 : vector<1x32xf32> to vector<8x32xf32>
    %247 = arith.addf %245, %246 : vector<8x32xf32>
    %248 = arith.truncf %247 : vector<8x32xf32> to vector<8x32xbf16>
    %c1_107 = arith.constant 1 : index
    %c0_108 = arith.constant 0 : index
    %c0_109 = arith.constant 0 : index
    %249 = vector.load %arg17[%c1_107, %c0_108, %c0_109] : memref<2x32x64xbf16, #tpu.memory_space<vmem>>, vector<1x32x64xbf16>
    %250 = vector.shape_cast %249 : vector<1x32x64xbf16> to vector<32x64xbf16>
    %cst_110 = arith.constant dense<0.000000e+00> : vector<8x64xf32>
    %251 = tpu.matmul %248, %250, %cst_110 {dimension_numbers = #tpu.dot_dimension_numbers<[1], [0], [0], [1], [0, 0, 1, 1], [], []>} : vector<8x32xbf16>, vector<32x64xbf16>, vector<8x64xf32> -> vector<8x64xf32>
    %c1_111 = arith.constant 1 : index
    %c0_112 = arith.constant 0 : index
    %c0_113 = arith.constant 0 : index
    %252 = vector.load %arg18[%c1_111, %c0_112, %c0_113] : memref<2x1x64xf32, #tpu.memory_space<vmem>>, vector<1x1x64xf32>
    %253 = vector.shape_cast %252 : vector<1x1x64xf32> to vector<1x64xf32>
    %254 = vector.broadcast %253 : vector<1x64xf32> to vector<8x64xf32>
    %255 = arith.addf %251, %254 : vector<8x64xf32>
    %cst_114 = arith.constant 0.000000e+00 : f32
    %256 = vector.broadcast %cst_114 : f32 to vector<8x64xf32>
    %257 = arith.maximumf %255, %256 : vector<8x64xf32>
    %258 = arith.truncf %257 : vector<8x64xf32> to vector<8x64xbf16>
    %c1_115 = arith.constant 1 : index
    %c0_116 = arith.constant 0 : index
    %c0_117 = arith.constant 0 : index
    %259 = vector.load %arg19[%c1_115, %c0_116, %c0_117] : memref<2x64x32xbf16, #tpu.memory_space<vmem>>, vector<1x64x32xbf16>
    %260 = vector.shape_cast %259 : vector<1x64x32xbf16> to vector<64x32xbf16>
    %cst_118 = arith.constant dense<0.000000e+00> : vector<8x32xf32>
    %261 = tpu.matmul %258, %260, %cst_118 {dimension_numbers = #tpu.dot_dimension_numbers<[1], [0], [0], [1], [0, 0, 1, 1], [], []>} : vector<8x64xbf16>, vector<64x32xbf16>, vector<8x32xf32> -> vector<8x32xf32>
    %c1_119 = arith.constant 1 : index
    %c0_120 = arith.constant 0 : index
    %c0_121 = arith.constant 0 : index
    %262 = vector.load %arg20[%c1_119, %c0_120, %c0_121] : memref<2x1x32xf32, #tpu.memory_space<vmem>>, vector<1x1x32xf32>
    %263 = vector.shape_cast %262 : vector<1x1x32xf32> to vector<1x32xf32>
    %264 = vector.broadcast %263 : vector<1x32xf32> to vector<8x32xf32>
    %265 = arith.addf %261, %264 : vector<8x32xf32>
    %266 = arith.addf %247, %265 : vector<8x32xf32>
    %c1_122 = arith.constant 1 : index
    %c0_123 = arith.constant 0 : index
    %c0_124 = arith.constant 0 : index
    %267 = vector.load %arg21[%c1_122, %c0_123, %c0_124] : memref<2x1x32xf32, #tpu.memory_space<vmem>>, vector<1x1x32xf32>
    %268 = vector.shape_cast %267 : vector<1x1x32xf32> to vector<1x32xf32>
    %c1_125 = arith.constant 1 : index
    %c0_126 = arith.constant 0 : index
    %c0_127 = arith.constant 0 : index
    %269 = vector.load %arg22[%c1_125, %c0_126, %c0_127] : memref<2x1x32xf32, #tpu.memory_space<vmem>>, vector<1x1x32xf32>
    %270 = vector.shape_cast %269 : vector<1x1x32xf32> to vector<1x32xf32>
    %cst_128 = arith.constant dense<0.000000e+00> : vector<8xf32>
    %271 = vector.multi_reduction <add>, %266, %cst_128 [1] : vector<8x32xf32> to vector<8xf32>
    %272 = vector.shape_cast %271 : vector<8xf32> to vector<8x1xf32>
    %cst_129 = arith.constant 3.200000e+01 : f32
    %273 = vector.broadcast %cst_129 : f32 to vector<8x1xf32>
    %274 = arith.divf %272, %273 : vector<8x1xf32>
    %275 = vector.broadcast %274 : vector<8x1xf32> to vector<8x32xf32>
    %276 = arith.subf %266, %275 : vector<8x32xf32>
    %277 = arith.mulf %276, %276 : vector<8x32xf32>
    %cst_130 = arith.constant dense<0.000000e+00> : vector<8xf32>
    %278 = vector.multi_reduction <add>, %277, %cst_130 [1] : vector<8x32xf32> to vector<8xf32>
    %279 = vector.shape_cast %278 : vector<8xf32> to vector<8x1xf32>
    %cst_131 = arith.constant 3.200000e+01 : f32
    %280 = vector.broadcast %cst_131 : f32 to vector<8x1xf32>
    %281 = arith.divf %279, %280 : vector<8x1xf32>
    %cst_132 = arith.constant 9.99999974E-6 : f32
    %282 = vector.broadcast %cst_132 : f32 to vector<8x1xf32>
    %283 = arith.addf %281, %282 : vector<8x1xf32>
    %284 = math.rsqrt %283 : vector<8x1xf32>
    %285 = vector.broadcast %284 : vector<8x1xf32> to vector<8x32xf32>
    %286 = arith.mulf %276, %285 : vector<8x32xf32>
    %287 = vector.broadcast %268 : vector<1x32xf32> to vector<8x32xf32>
    %288 = arith.mulf %286, %287 : vector<8x32xf32>
    %289 = vector.broadcast %270 : vector<1x32xf32> to vector<8x32xf32>
    %290 = arith.addf %288, %289 : vector<8x32xf32>
    %291 = vector.shape_cast %290 : vector<8x32xf32> to vector<1x8x32xf32>
    %c0_133 = arith.constant 0 : index
    %c0_134 = arith.constant 0 : index
    %c0_135 = arith.constant 0 : index
    %292 = vector.load %arg4[%c0_133, %c0_134, %c0_135] : memref<1x8x1xf32, #tpu.memory_space<vmem>>, vector<1x8x1xf32>
    %293 = vector.broadcast %292 : vector<1x8x1xf32> to vector<1x8x32xf32>
    %294 = arith.mulf %291, %293 : vector<1x8x32xf32>
    %cst_136 = arith.constant dense<0.000000e+00> : vector<1x32xf32>
    %295 = vector.multi_reduction <add>, %294, %cst_136 [1] : vector<1x8x32xf32> to vector<1x32xf32>
    %cst_137 = arith.constant dense<0.000000e+00> : vector<1x1xf32>
    %296 = vector.multi_reduction <add>, %292, %cst_137 [1] : vector<1x8x1xf32> to vector<1x1xf32>
    %cst_138 = arith.constant 1.000000e+00 : f32
    %297 = vector.broadcast %cst_138 : f32 to vector<1x1xf32>
    %298 = arith.maximumf %296, %297 : vector<1x1xf32>
    %299 = vector.broadcast %298 : vector<1x1xf32> to vector<1x32xf32>
    %300 = arith.divf %295, %299 : vector<1x32xf32>
    %c0_139 = arith.constant 0 : index
    %c0_140 = arith.constant 0 : index
    %c0_141 = arith.constant 0 : index
    %301 = vector.load %arg5[%c0_139, %c0_140, %c0_141] : memref<1x1x1xf32, #tpu.memory_space<vmem>>, vector<1x1x1xf32>
    %302 = vector.shape_cast %301 : vector<1x1x1xf32> to vector<1x1xf32>
    %c0_142 = arith.constant 0 : index
    %c0_143 = arith.constant 0 : index
    %303 = vector.load %arg23[%c0_142, %c0_143] : memref<1x32xf32, #tpu.memory_space<vmem>>, vector<1x32xf32>
    %304 = vector.broadcast %302 : vector<1x1xf32> to vector<1x32xf32>
    %305 = arith.mulf %304, %303 : vector<1x32xf32>
    %306 = arith.addf %300, %305 : vector<1x32xf32>
    %c0_144 = arith.constant 0 : index
    %c0_145 = arith.constant 0 : index
    %307 = vector.load %arg24[%c0_144, %c0_145] : memref<1x32xf32, #tpu.memory_space<vmem>>, vector<1x32xf32>
    %308 = arith.addf %306, %307 : vector<1x32xf32>
    %309 = arith.truncf %308 : vector<1x32xf32> to vector<1x32xbf16>
    %c0_146 = arith.constant 0 : index
    %c0_147 = arith.constant 0 : index
    %310 = vector.load %arg25[%c0_146, %c0_147] : memref<32x16xbf16, #tpu.memory_space<vmem>>, vector<32x16xbf16>
    %cst_148 = arith.constant dense<0.000000e+00> : vector<1x16xf32>
    %311 = tpu.matmul %309, %310, %cst_148 {dimension_numbers = #tpu.dot_dimension_numbers<[1], [0], [0], [1], [0, 0, 1, 1], [], []>} : vector<1x32xbf16>, vector<32x16xbf16>, vector<1x16xf32> -> vector<1x16xf32>
    %c0_149 = arith.constant 0 : index
    %c0_150 = arith.constant 0 : index
    %312 = vector.load %arg26[%c0_149, %c0_150] : memref<1x16xf32, #tpu.memory_space<vmem>>, vector<1x16xf32>
    %313 = arith.addf %311, %312 : vector<1x16xf32>
    %cst_151 = arith.constant 0.000000e+00 : f32
    %314 = vector.broadcast %cst_151 : f32 to vector<1x16xf32>
    %315 = arith.maximumf %313, %314 : vector<1x16xf32>
    %c0_152 = arith.constant 0 : index
    %c0_153 = arith.constant 0 : index
    %316 = vector.load %arg27[%c0_152, %c0_153] : memref<1x16xf32, #tpu.memory_space<vmem>>, vector<1x16xf32>
    %317 = arith.mulf %315, %316 : vector<1x16xf32>
    %cst_154 = arith.constant dense<0.000000e+00> : vector<1xf32>
    %318 = vector.multi_reduction <add>, %317, %cst_154 [1] : vector<1x16xf32> to vector<1xf32>
    %319 = vector.shape_cast %318 : vector<1xf32> to vector<1x1xf32>
    %c0_155 = arith.constant 0 : index
    %c0_156 = arith.constant 0 : index
    %320 = vector.load %arg28[%c0_155, %c0_156] : memref<1x1xf32, #tpu.memory_space<vmem>>, vector<1x1xf32>
    %321 = arith.addf %319, %320 : vector<1x1xf32>
    %322 = vector.shape_cast %321 : vector<1x1xf32> to vector<1x1x1xf32>
    %c0_157 = arith.constant 0 : index
    %c0_158 = arith.constant 0 : index
    %c0_159 = arith.constant 0 : index
    %323 = vector.load %arg29[%c0_157, %c0_158, %c0_159] : memref<1x1x1xf32, #tpu.memory_space<vmem>>, vector<1x1x1xf32>
    tpu.vector_store %arg29[%c0_157, %c0_158, %c0_159], %322 {strides = array<i32>} : memref<1x1x1xf32, #tpu.memory_space<vmem>>, vector<1x1x1xf32>,
    return
  }
  func.func @transform_0(%arg0: i32) -> (i32, i32, i32) {
    %c0_i32 = arith.constant 0 : i32
    %c0_i32_0 = arith.constant 0 : i32
    %c0_i32_1 = arith.constant 0 : i32
    return %arg0, %c0_i32, %c0_i32_0 : i32, i32, i32
  }
  func.func @transform_1(%arg0: i32) -> (i32, i32, i32) {
    %c0_i32 = arith.constant 0 : i32
    %c0_i32_0 = arith.constant 0 : i32
    %c0_i32_1 = arith.constant 0 : i32
    return %arg0, %c0_i32, %c0_i32_0 : i32, i32, i32
  }
  func.func @transform_2(%arg0: i32) -> (i32, i32, i32) {
    %c0_i32 = arith.constant 0 : i32
    %c0_i32_0 = arith.constant 0 : i32
    %c0_i32_1 = arith.constant 0 : i32
    return %arg0, %c0_i32, %c0_i32_0 : i32, i32, i32
  }
  func.func @transform_3(%arg0: i32) -> (i32, i32, i32) {
    %c0_i32 = arith.constant 0 : i32
    %c0_i32_0 = arith.constant 0 : i32
    %c0_i32_1 = arith.constant 0 : i32
    return %arg0, %c0_i32, %c0_i32_0 : i32, i32, i32
  }
  func.func @transform_4(%arg0: i32) -> (i32, i32, i32) {
    %c0_i32 = arith.constant 0 : i32
    %c0_i32_0 = arith.constant 0 : i32
    %c0_i32_1 = arith.constant 0 : i32
    return %arg0, %c0_i32, %c0_i32_0 : i32, i32, i32
  }
  func.func @transform_5(%arg0: i32) -> (i32, i32) {
    %c0_i32 = arith.constant 0 : i32
    %c0_i32_0 = arith.constant 0 : i32
    %c0_i32_1 = arith.constant 0 : i32
    return %c0_i32, %c0_i32_0 : i32, i32
  }
  func.func @transform_6(%arg0: i32) -> (i32, i32) {
    %c0_i32 = arith.constant 0 : i32
    %c0_i32_0 = arith.constant 0 : i32
    %c0_i32_1 = arith.constant 0 : i32
    return %c0_i32, %c0_i32_0 : i32, i32
  }
  func.func @transform_7(%arg0: i32) -> (i32, i32) {
    %c0_i32 = arith.constant 0 : i32
    %c0_i32_0 = arith.constant 0 : i32
    %c0_i32_1 = arith.constant 0 : i32
    return %c0_i32, %c0_i32_0 : i32, i32
  }
  func.func @transform_8(%arg0: i32) -> (i32, i32) {
    %c0_i32 = arith.constant 0 : i32
    %c0_i32_0 = arith.constant 0 : i32
    %c0_i32_1 = arith.constant 0 : i32
    return %c0_i32, %c0_i32_0 : i32, i32
  }
  func.func @transform_9(%arg0: i32) -> (i32, i32) {
    %c0_i32 = arith.constant 0 : i32
    %c0_i32_0 = arith.constant 0 : i32
    %c0_i32_1 = arith.constant 0 : i32
    return %c0_i32, %c0_i32_0 : i32, i32
  }
  func.func @transform_10(%arg0: i32) -> (i32, i32, i32) {
    %c0_i32 = arith.constant 0 : i32
    %c0_i32_0 = arith.constant 0 : i32
    %c0_i32_1 = arith.constant 0 : i32
    %c0_i32_2 = arith.constant 0 : i32
    return %c0_i32, %c0_i32_0, %c0_i32_1 : i32, i32, i32
  }
  func.func @transform_11(%arg0: i32) -> (i32, i32, i32) {
    %c0_i32 = arith.constant 0 : i32
    %c0_i32_0 = arith.constant 0 : i32
    %c0_i32_1 = arith.constant 0 : i32
    %c0_i32_2 = arith.constant 0 : i32
    return %c0_i32, %c0_i32_0, %c0_i32_1 : i32, i32, i32
  }
  func.func @transform_12(%arg0: i32) -> (i32, i32, i32) {
    %c0_i32 = arith.constant 0 : i32
    %c0_i32_0 = arith.constant 0 : i32
    %c0_i32_1 = arith.constant 0 : i32
    %c0_i32_2 = arith.constant 0 : i32
    return %c0_i32, %c0_i32_0, %c0_i32_1 : i32, i32, i32
  }
  func.func @transform_13(%arg0: i32) -> (i32, i32, i32) {
    %c0_i32 = arith.constant 0 : i32
    %c0_i32_0 = arith.constant 0 : i32
    %c0_i32_1 = arith.constant 0 : i32
    %c0_i32_2 = arith.constant 0 : i32
    return %c0_i32, %c0_i32_0, %c0_i32_1 : i32, i32, i32
  }
  func.func @transform_14(%arg0: i32) -> (i32, i32, i32) {
    %c0_i32 = arith.constant 0 : i32
    %c0_i32_0 = arith.constant 0 : i32
    %c0_i32_1 = arith.constant 0 : i32
    %c0_i32_2 = arith.constant 0 : i32
    return %c0_i32, %c0_i32_0, %c0_i32_1 : i32, i32, i32
  }
  func.func @transform_15(%arg0: i32) -> (i32, i32, i32) {
    %c0_i32 = arith.constant 0 : i32
    %c0_i32_0 = arith.constant 0 : i32
    %c0_i32_1 = arith.constant 0 : i32
    %c0_i32_2 = arith.constant 0 : i32
    return %c0_i32, %c0_i32_0, %c0_i32_1 : i32, i32, i32
  }
  func.func @transform_16(%arg0: i32) -> (i32, i32, i32) {
    %c0_i32 = arith.constant 0 : i32
    %c0_i32_0 = arith.constant 0 : i32
    %c0_i32_1 = arith.constant 0 : i32
    %c0_i32_2 = arith.constant 0 : i32
    return %c0_i32, %c0_i32_0, %c0_i32_1 : i32, i32, i32
  }
  func.func @transform_17(%arg0: i32) -> (i32, i32, i32) {
    %c0_i32 = arith.constant 0 : i32
    %c0_i32_0 = arith.constant 0 : i32
    %c0_i32_1 = arith.constant 0 : i32
    %c0_i32_2 = arith.constant 0 : i32
    return %c0_i32, %c0_i32_0, %c0_i32_1 : i32, i32, i32
  }
  func.func @transform_18(%arg0: i32) -> (i32, i32, i32) {
    %c0_i32 = arith.constant 0 : i32
    %c0_i32_0 = arith.constant 0 : i32
    %c0_i32_1 = arith.constant 0 : i32
    %c0_i32_2 = arith.constant 0 : i32
    return %c0_i32, %c0_i32_0, %c0_i32_1 : i32, i32, i32
  }
  func.func @transform_19(%arg0: i32) -> (i32, i32, i32) {
    %c0_i32 = arith.constant 0 : i32
    %c0_i32_0 = arith.constant 0 : i32
    %c0_i32_1 = arith.constant 0 : i32
    %c0_i32_2 = arith.constant 0 : i32
    return %c0_i32, %c0_i32_0, %c0_i32_1 : i32, i32, i32
  }
  func.func @transform_20(%arg0: i32) -> (i32, i32, i32) {
    %c0_i32 = arith.constant 0 : i32
    %c0_i32_0 = arith.constant 0 : i32
    %c0_i32_1 = arith.constant 0 : i32
    %c0_i32_2 = arith.constant 0 : i32
    return %c0_i32, %c0_i32_0, %c0_i32_1 : i32, i32, i32
  }
  func.func @transform_21(%arg0: i32) -> (i32, i32, i32) {
    %c0_i32 = arith.constant 0 : i32
    %c0_i32_0 = arith.constant 0 : i32
    %c0_i32_1 = arith.constant 0 : i32
    %c0_i32_2 = arith.constant 0 : i32
    return %c0_i32, %c0_i32_0, %c0_i32_1 : i32, i32, i32
  }
  func.func @transform_22(%arg0: i32) -> (i32, i32) {
    %c0_i32 = arith.constant 0 : i32
    %c0_i32_0 = arith.constant 0 : i32
    %c0_i32_1 = arith.constant 0 : i32
    return %c0_i32, %c0_i32_0 : i32, i32
  }
  func.func @transform_23(%arg0: i32) -> (i32, i32) {
    %c0_i32 = arith.constant 0 : i32
    %c0_i32_0 = arith.constant 0 : i32
    %c0_i32_1 = arith.constant 0 : i32
    return %c0_i32, %c0_i32_0 : i32, i32
  }
  func.func @transform_24(%arg0: i32) -> (i32, i32) {
    %c0_i32 = arith.constant 0 : i32
    %c0_i32_0 = arith.constant 0 : i32
    %c0_i32_1 = arith.constant 0 : i32
    return %c0_i32, %c0_i32_0 : i32, i32
  }
  func.func @transform_25(%arg0: i32) -> (i32, i32) {
    %c0_i32 = arith.constant 0 : i32
    %c0_i32_0 = arith.constant 0 : i32
    %c0_i32_1 = arith.constant 0 : i32
    return %c0_i32, %c0_i32_0 : i32, i32
  }
  func.func @transform_26(%arg0: i32) -> (i32, i32) {
    %c0_i32 = arith.constant 0 : i32
    %c0_i32_0 = arith.constant 0 : i32
    %c0_i32_1 = arith.constant 0 : i32
    return %c0_i32, %c0_i32_0 : i32, i32
  }
  func.func @transform_27(%arg0: i32) -> (i32, i32) {
    %c0_i32 = arith.constant 0 : i32
    %c0_i32_0 = arith.constant 0 : i32
    %c0_i32_1 = arith.constant 0 : i32
    return %c0_i32, %c0_i32_0 : i32, i32
  }
  func.func @transform_28(%arg0: i32) -> (i32, i32, i32) {
    %c0_i32 = arith.constant 0 : i32
    %c0_i32_0 = arith.constant 0 : i32
    %c0_i32_1 = arith.constant 0 : i32
    return %arg0, %c0_i32, %c0_i32_0 : i32, i32, i32
  }
}

</mosaic_0001>

<bundles_post_ra>
// kernel: tpu_custom_call.1
= control target key start
LH: loop header
LB: loop body
LE: loop exit
PB: predicated region body
PF: predicated region fallthrough
CT: control target
= control target key end

     0   :  { %s4005_s0 = inlined_call_operand.vmem [shape: s32[2,8,1], index: 0, kind: input, shape index: {}]   ;;  %s4006_s1 = inlined_call_operand.vmem [shape: f32[2,8,2], index: 1, kind: input, shape index: {}]   ;;  %s4007_s2 = inlined_call_operand.vmem [shape: f32[2,1,8], index: 2, kind: input, shape index: {}]   ;;  %s4008_s3 = inlined_call_operand.vmem [shape: f32[2,8,1], index: 3, kind: input, shape index: {}]   ;;  %s4009_s4 = inlined_call_operand.vmem [shape: f32[2,1,1], index: 4, kind: input, shape index: {}]   ;;  %s4010_s5 = inlined_call_operand.vmem [shape: bf16[32,32], index: 5, kind: input, shape index: {}]   ;;  %s4011_s6 = inlined_call_operand.vmem [shape: f32[2,32], index: 6, kind: input, shape index: {}]   ;;  %s4012_s7 = inlined_call_operand.vmem [shape: f32[1,32], index: 7, kind: input, shape index: {}]   ;;  %s4013_s8 = inlined_call_operand.vmem [shape: bf16[32,32], index: 8, kind: input, shape index: {}]   ;;  %s4014_s9 = inlined_call_operand.vmem [shape: f32[1,32], index: 9, kind: input, shape index: {}]   ;;  %s4015_s10 = inlined_call_operand.vmem [shape: bf16[2,32,96], index: 10, kind: input, shape index: {}]   ;;  %s4016_s11 = inlined_call_operand.vmem [shape: f32[2,1,96], index: 11, kind: input, shape index: {}]   ;;  %s4017_s12 = inlined_call_operand.vmem [shape: bf16[2,32,32], index: 12, kind: input, shape index: {}]   ;;  %s4018_s13 = inlined_call_operand.vmem [shape: f32[2,1,32], index: 13, kind: input, shape index: {}]   ;;  %s4019_s14 = inlined_call_operand.vmem [shape: f32[2,1,32], index: 14, kind: input, shape index: {}]   ;;  %s4020_s15 = inlined_call_operand.vmem [shape: f32[2,1,32], index: 15, kind: input, shape index: {}]   ;;  %s4021_s16 = inlined_call_operand.vmem [shape: bf16[2,32,64], index: 16, kind: input, shape index: {}]   ;;  %s4022_s17 = inlined_call_operand.vmem [shape: f32[2,1,64], index: 17, kind: input, shape index: {}]   ;;  %s4023_s18 = inlined_call_operand.vmem [shape: bf16[2,64,32], index: 18, kind: input, shape index: {}]   ;;  %s4024_s19 = inlined_call_operand.vmem [shape: f32[2,1,32], index: 19, kind: input, shape index: {}]   ;;  %s4025_s20 = inlined_call_operand.vmem [shape: f32[2,1,32], index: 20, kind: input, shape index: {}]   ;;  %s4026_s21 = inlined_call_operand.vmem [shape: f32[2,1,32], index: 21, kind: input, shape index: {}]   ;;  %s4027_s22 = inlined_call_operand.vmem [shape: f32[1,32], index: 22, kind: input, shape index: {}]   ;;  %s4028_s23 = inlined_call_operand.vmem [shape: f32[1,32], index: 23, kind: input, shape index: {}]   ;;  %s4029_s24 = inlined_call_operand.vmem [shape: bf16[32,16], index: 24, kind: input, shape index: {}]   ;;  %s4030_s25 = inlined_call_operand.vmem [shape: f32[1,16], index: 25, kind: input, shape index: {}]   ;;  %s4031_s26 = inlined_call_operand.vmem [shape: f32[1,16], index: 26, kind: input, shape index: {}]   ;;  %s4032_s27 = inlined_call_operand.<no memory space> [shape: f32[1,1], index: 27, kind: input, shape index: {}]   ;;  %s4033_s28 = inlined_call_operand.vmem [shape: f32[2,1,1], index: 28, kind: output, shape index: {}]  }
   0x1   :  { %4052 = sst [smem:[#allocation4_spill]] %s4005_s0  ;;  %v33_v0 = vstv %s4032_s27 }
   0x2   :  { %4053 = sst [smem:[#allocation5_spill]] %s4006_s1  ;;  %34 = vst [vmem:[#allocation2] sm:$0x1] %v33_v0 }
   0x3   :  { %4054 = sst [smem:[#allocation6_spill]] %s4007_s2 }
   0x4   :  { %4055 = sst [smem:[#allocation7_spill]] %s4008_s3 }
   0x5   :  { %4056 = sst [smem:[#allocation8_spill]] %s4009_s4 }
   0x6   :  { %4057 = sst [smem:[#allocation9_spill]] %s4010_s5 }
   0x7   :  { %4058 = sst [smem:[#allocation10_spill]] %s4011_s6 }
   0x8   :  { %4059 = sst [smem:[#allocation11_spill]] %s4012_s7 }
   0x9   :  { %4060 = sst [smem:[#allocation12_spill]] %s4013_s8 }
   0xa   :  { %4061 = sst [smem:[#allocation13_spill]] %s4014_s9  ;;  %s3553_s9 = smov 0  }
   0xb   :  { %4062 = sst [smem:[#allocation14_spill]] %s4015_s10 }
   0xc   :  { %4063 = sst [smem:[#allocation15_spill]] %s4016_s11 }
   0xd   :  { %4064 = sst [smem:[#allocation16_spill]] %s4017_s12 }
   0xe LB: > { %4065 = sst [smem:[#allocation3_spill]] %s3391_s9  ;;  %s2921_s30 = sadd.s32 4294967295, %s3391_s9   ;;  %s3391_s9 = sphi %s3553_s9, %s40_s9  }
   0xf   : > { %p2925_p0 = scmp.ge.s32.totalorder %s3391_s9, 1  ;;  %p797_p1 = scmp.lt.s32.totalorder %s3391_s9, 3 }
  0x11   : > { %p798_p2 = pnand %p2925_p0, %p797_p1 }
  0x12   : > { %p882_p3 = scmp.lt.s32.totalorder (!%p798_p2), %s2921_s30, 1  ;;  %s4066_s6 = sld [smem:[#allocation9_spill]] (!%p798_p2) }
  0x13   : > { %801 = sbr.rel (%p798_p2) target bundleno = 5684 (0x1634), region = 132  ;;  %s4067_s29 = sld [smem:[#allocation5_spill]] (!%p798_p2) }
  0x14   : > { %s4068_s1 = sld [smem:[#allocation4_spill]] (!%p798_p2)  ;;  %s3399_s8 = smov (!%p798_p2), 112  }
  0x15   : > { %s4069_s27 = sld [smem:[#allocation12_spill]] (!%p798_p2)  ;;  %s4042_s3 = smov (!%p798_p2), 96  }
  0x16   : > { %s4072_s5 = sld [smem:[#allocation14_spill]] (!%p798_p2)  ;;  %s4044_s7 = smov (!%p798_p2), 24  }
  0x17   : > { %s4074_s12 = sld [smem:[#allocation15_spill]] (!%p798_p2)  ;;  %s4077_s0 = smov (!%p798_p2), 120  }
  0x18   : > { %v3393_v1 = vmov 0   ;;  %s4088_s30 = smov (!%p882_p3, %s2921_s30), 1  ;;  %v3317_v2 = vld [vmem:[%s4066_s6 + $0x8] sm:$0xff]   ;;  %v3394_v3 = vmov 0.0   ;;  %v3319_v7 = vld [vmem:[%s4066_s6] sm:$0xff]   ;;  %v3395_v8 = vmov 1   ;;  %v905_v10 = vlaneseq }
  0x19   : > { %3313 = vset.pattern.permute.xlu0 %v3393_v1  ;;  %3315 = vset.pattern.permute.xlu1 %v3393_v1  ;;  %s3567_s10 = sshll.u32 %s4088_s30, 3  ;;  %vm3396_vm0 = vmmov 0   ;;  %vm973_vm2 = vcmask 261120   ;;  %vm1152_vm3 = vcmask 64512   ;;  %s4075_s9 = sld [smem:[#allocation6_spill]]  ;;  %vm1410_vm4 = vcmask 1043456  }
  0x1a   : > { %3109 = vmatprep.subr.bf16.mxu1 %v3394_v3  ;;  %3101 = vmatprep.subr.bf16.mxu0 %v3394_v3  ;;  %s889_s2 = scalar_lea.vmem %s4067_s29, %s3567_s10  ;;  %s885_s4 = scalar_lea.vmem %s4068_s1, %s3567_s10  ;;  %v926_v11 = vshrl.u32 %v905_v10, 7  ;;  %v906_v12 = vand.u32 127, %v905_v10  ;;  %vm1611_vm5 = vcmask 130048   ;;  %vm1613_vm6 = vcmask 195584  }
  0x1b   : > { %3110 = vmatpush3.bf16.msra.mxu1 %v3317_v2  ;;  %v918_v4 = vld [vmem:[%s889_s2] sm:$0xff]  ;;  %v3318_v6 = vld [vmem:[%s4069_s27 + $0x8] sm:$0xff]   ;;  %3113 = vmatprep.mubr.msk.bf16.mxu1 %vm3396_vm0, %v3394_v3  ;;  %s4070_s2 = sld [smem:[#allocation10_spill]]  ;;  %vm1821_vm7 = vcmask 523264   ;;  %vm2729_vm8 = vcmask 7168   ;;  %vm2824_vm9 = vcmask 122880  }
  0x1c   : > { %v904_v5 = vld [vmem:[%s885_s4] sm:$0xff]  ;;  %3111 = vmatprep.subr.bf16.mxu1 %v3394_v3  ;;  %922 = vperm.xlu0 %3313, %v918_v4   ;;  %v3596_v13 = vsub.s32 0, %v926_v11  ;;  %v936_v14 = vsub.s32 1, %v926_v11  ;;  %s4071_s1 = sld [smem:[#allocation11_spill]]  ;;  %v3321_v30 = vld [vmem:[%s4072_s5 + $0x8] sm:$0xff]   ;;  %s4048_s4 = smov 120  }
  0x1d   : > { %908 = vperm.xlu1 %3315, %v904_v5   ;;  %3102 = vmatpush3.bf16.msra.mxu0 %v3318_v6  ;;  %v3320_v9 = vld [vmem:[%s4069_s27] sm:$0xff]   ;;  %s4073_s29 = sld [smem:[#allocation13_spill]]  ;;  %vm2830_vm10 = vcmask 0  }
  0x1e   : > { %3103 = vmatprep.subr.bf16.mxu0 %v3394_v3  ;;  %3105 = vmatprep.mubr.msk.bf16.mxu0 %vm3396_vm0, %v3394_v3  ;;  %v3322_v31 = vld [vmem:[%s4072_s5] sm:$0xff]   ;;  %s4076_s11 = sld [smem:[#allocation16_spill]] }
  0x1f   : > { %3112 = vmatpush3.bf16.msra.mxu1 %v3319_v7  ;;  %v2939_v44 = vld [vmem:[%s4074_s12] ss:$0 sm:$0xff] }
  0x20   : > { %3314 = vset.pattern.permute.xlu0 %v3395_v8  ;;  %3125 = vmatprep.subr.bf16.mxu1 %v3394_v3 }
  0x21   : > { %931 = vperm.xlu0 %3314, %v918_v4   ;;  %3104 = vmatpush3.bf16.msra.mxu0 %v3320_v9  ;;  %v919_v15 = vld [vmem:[%s4070_s2] sm:$0x3]  ;;  %s4040_s2 = smov 64  }
  0x22   : > { %3117 = vmatprep.subr.bf16.mxu0 %v3394_v3  ;;  %v928_v18 = vrot.slane %v919_v15, %v3596_v13  ;;  %v937_v19 = vrot.slane %v919_v15, %v936_v14  ;;  %v2930_v25 = vld [vmem:[%s4071_s1] ss:$0 sm:$0xff]  ;;  %s4047_s1 = smov 104  }
  0x23   : > { %v2931_v36 = vld [vmem:[%s4073_s29] ss:$0 sm:$0xff]  ;;  %s892_s29 = scalar_lea.vmem %s4075_s9, %s4088_s30  ;;  %s4078_s9 = smov 104  }
  0x24   : > { %v1072_v62 = vld [vmem:[%s892_s29] sm:$0x1] }
  0x25   : > { %3316 = vset.pattern.permute.xlu0 %v3393_v1  ;;  %v2938_v63 = vadd.f32 -1.0, %v1072_v62 }
  0x27   : > { %v1074_v0 = vmul.f32 1e+30, %v2938_v63 }
  0x29   : > { %v3684_v1 = vrot.slane %v1074_v0, %v3596_v13 }
  0x97   : > { %v923_v16 = vpop.permute.xlu0 %922 }
  0x98   : > { %v909_v17 = vpop.permute.xlu1 %908  ;;  %v929_v23 = vmul.f32 %v928_v18, %v923_v16 }
  0x99   : > { %vm910_vm1 = vcmp.eq.s32.totalorder %v909_v17, %v906_v12 }
  0x9a   : > { %v2929_v20 = vsel %vm910_vm1, 1.0, %v3394_v3 }
  0x9b   : > { %v913_v21 = vpack.c.bf16 %v2929_v20, %v2929_v20 }
  0x9c   : > { %v932_v22 = vpop.permute.xlu0 %931 }
  0x9d   : > { %3114 = vmatmul.mubr.msk.bf16.vlgmr.msra.gmra.mxu1 %vm973_vm2, %v913_v21  ;;  %v938_v24 = vmul.f32 %v937_v19, %v932_v22 }
  0x9e   : > { %3127 = vmatprep.mubr.msk.bf16.mxu1 %vm3396_vm0, %v3394_v3 }
  0x9f   : > { %v939_v26 = vadd.f32 %v938_v24, %v929_v23 }
  0xa1   : > { %v947_v27 = vadd.f32 %v2930_v25, %v939_v26 }
  0xa3   : > { %v948_v28 = vmax.f32 %v947_v27, 0.0 }
  0xa5   : > { %v949_v29 = vpack.c.bf16 %v948_v28, %v948_v28 }
  0xa7   : > { %3106 = vmatmul.mubr.msk.bf16.vlgmr.msra.gmra.mxu0 %vm973_vm2, %v949_v29 }
  0xa8   : > { %3121 = vmatprep.mubr.msk.bf16.mxu0 %vm3396_vm0, %v3394_v3  ;;  %3118 = vmatpush3.bf16.msra.mxu0 %v3321_v30 }
  0xa9   : > { %3119 = vmatprep.subr.bf16.mxu0 %v3394_v3 }
  0xac   : > { %3120 = vmatpush3.bf16.msra.mxu0 %v3322_v31 }
  0xad   : > { %3131 = vmatprep.subr.bf16.mxu0 %v3394_v3 }
 0x15d   : > { %v1066_v32 = vpop.f32.mrf.mxu1 }
 0x15f   : > { %v3115_v33 = vpop.f32.mrf.mxu1 }
 0x161   : > { %v1069_v34 = vpop.f32.mrf.mxu1 }
 0x163   : > { %v3116_v35 = vpop.f32.mrf.mxu1 }
 0x167   : > { %v1011_v37 = vpop.f32.mrf.mxu0 }
 0x168   : > { %v1012_v38 = vadd.f32 %v2931_v36, %v1011_v37 }
 0x169   : > { %v3107_v39 = vpop.f32.mrf.mxu0 }
 0x16a   : > { %v3623_v40 = vadd.f32 %v1066_v32, %v1012_v38 }
 0x16b   : > { %v1014_v41 = vpop.f32.mrf.mxu0 }
 0x16c   : > { %v1075_v42 = vpack.c.bf16 %v3623_v40, %v3623_v40 }
 0x16d   : > { %v3108_v43 = vpop.f32.mrf.mxu0 }
 0x16e   : > { %3122 = vmatmul.mubr.msk.bf16.vlgmr.msra.gmra.mxu0 %vm973_vm2, %v1075_v42 }
 0x16f   : > { %3133 = vmatprep.mubr.msk.bf16.mxu0 %vm3396_vm0, %v3394_v3 }
 0x22e   : > { %v1136_v45 = vpop.f32.mrf.mxu0 }
 0x22f   : > { %v1137_v46 = vadd.f32 %v2939_v44, %v1136_v45 }
 0x230   : > { %v3123_v47 = vpop.f32.mrf.mxu0 }
 0x231   : > { %v3633_v48 = vpack.c.bf16 %v1137_v46, %v1137_v46 }
 0x232   : > { %v1139_v49 = vpop.f32.mrf.mxu0 }
 0x233   : > { %1148 = vrot.lane.b32.xlu0 %v3633_v48, %s4047_s1  ;;  %1144 = vrot.lane.b32.xlu1 %v3633_v48, %s4048_s4  ;;  %s4081_s4 = smov 8  }
 0x234   : > { %v3124_v50 = vpop.f32.mrf.mxu0 }
 0x237   : > { %1146 = vrot.lane.b32.xlu1 %v3633_v48, %s3399_s8 }
 0x23b   : > { %1150 = vrot.lane.b32.xlu1 %v3633_v48, %s4042_s3 }
 0x2a5   : > { %v3643_v51 = vpop.permute.xlu1 %1144  ;;  %v3647_v52 = vpop.permute.xlu0 %1148 }
 0x2a6   : > { %1199 = vrot.lane.b32.xlu0 %v3643_v51, %s4042_s3 }
 0x2a9   : > { %v3649_v53 = vpop.permute.xlu1 %1146 }
 0x2aa   : > { %1295 = vrot.lane.b32.xlu0 %v3647_v52, %s4042_s3  ;;  %1247 = vrot.lane.b32.xlu1 %v3649_v53, %s4042_s3  ;;  %s4045_s3 = smov 16  }
 0x2ad   : > { %v1151_v54 = vpop.permute.xlu1 %1150 }
 0x2ae   : > { %v1157_v55 = vsel %vm1152_vm3, %v1151_v54, 0 }
 0x2af   : > { %3126 = vmatpush3.bf16.xpose.msra.mxu1 %v1157_v55 }
 0x2b0   : > { %3137 = vmatprep.subr.bf16.mxu1 %v3394_v3 }
 0x2b6   : > { %3128 = vmatmul.mubr.msk.bf16.vlgmr.msra.gmra.mxu1 %vm1152_vm3, %v3633_v48 }
 0x2b7   : > { %3139 = vmatprep.mubr.msk.bf16.mxu1 %vm3396_vm0, %v3394_v3 }
 0x318   : > { %v1200_v56 = vpop.permute.xlu0 %1199 }
 0x319   : > { %v1205_v57 = vsel %vm1152_vm3, %v1200_v56, 0 }
 0x31a   : > { %3132 = vmatpush3.bf16.xpose.msra.mxu0 %v1205_v57 }
 0x31b   : > { %3143 = vmatprep.subr.bf16.mxu0 %v3394_v3 }
 0x31c   : > { %v1248_v58 = vpop.permute.xlu1 %1247  ;;  %v1296_v60 = vpop.permute.xlu0 %1295 }
 0x31d   : > { %v1253_v59 = vsel %vm1152_vm3, %v1248_v58, 0  ;;  %v1301_v61 = vsel %vm1152_vm3, %v1296_v60, 0 }
 0x31e   : > { %3138 = vmatpush3.bf16.xpose.msra.mxu1 %v1253_v59 }
 0x31f   : > { %3149 = vmatprep.subr.bf16.mxu1 %v3394_v3 }
 0x321   : > { %3134 = vmatmul.mubr.msk.bf16.vlgmr.msra.gmra.mxu0 %vm1152_vm3, %v3643_v51 }
 0x322   : > { %3144 = vmatpush3.bf16.xpose.msra.mxu0 %v1301_v61  ;;  %3145 = vmatprep.mubr.msk.bf16.mxu0 %vm3396_vm0, %v3394_v3 }
 0x323   : > { %3155 = vmatprep.subr.bf16.mxu0 %v3394_v3 }
 0x325   : > { %3140 = vmatmul.mubr.msk.bf16.vlgmr.msra.gmra.mxu1 %vm1152_vm3, %v3649_v53 }
 0x326   : > { %3151 = vmatprep.mubr.msk.bf16.mxu1 %vm3396_vm0, %v3394_v3 }
 0x329   : > { %3146 = vmatmul.mubr.msk.bf16.vlgmr.msra.gmra.mxu0 %vm1152_vm3, %v3647_v52 }
 0x32a   : > { %3157 = vmatprep.mubr.msk.bf16.mxu0 %vm3396_vm0, %v3394_v3 }
 0x376   : > { %v1193_v2 = vpop.f32.mrf.mxu1 }
 0x377   : > { %v1343_v4 = vmul.f32 0.35355338, %v1193_v2 }
 0x378   : > { %v3129_v5 = vpop.f32.mrf.mxu1 }
 0x379   : > { %v1353_v6 = vadd.f32 %v3684_v1, %v1343_v4 }
 0x37a   : > { %v1196_v7 = vpop.f32.mrf.mxu1 }
 0x37b   : > { %v1357_v8 = vsel %vm1152_vm3, %v1353_v6, -inf }
 0x37c   : > { %1358 = vmax.xlane.f32.xlu1 %v1357_v8  ;;  %v3130_v9 = vpop.f32.mrf.mxu1 }
 0x3e1   : > { %v1241_v10 = vpop.f32.mrf.mxu0 }
 0x3e2   : > { %v1344_v11 = vmul.f32 0.35355338, %v1241_v10 }
 0x3e3   : > { %v3135_v12 = vpop.f32.mrf.mxu0 }
 0x3e4   : > { %v1354_v14 = vadd.f32 %v3684_v1, %v1344_v11 }
 0x3e5   : > { %v1244_v15 = vpop.f32.mrf.mxu0  ;;  %v1289_v16 = vpop.f32.mrf.mxu1 }
 0x3e6   : > { %v1345_v17 = vmul.f32 0.35355338, %v1289_v16  ;;  %v1360_v18 = vsel %vm1152_vm3, %v1354_v14, -inf }
 0x3e7   : > { %1361 = vmax.xlane.f32.xlu0 %v1360_v18  ;;  %v3136_v19 = vpop.f32.mrf.mxu0  ;;  %v3141_v20 = vpop.f32.mrf.mxu1 }
 0x3e8   : > { %v1355_v21 = vadd.f32 %v3684_v1, %v1345_v17  ;;  %v3323_v20 = vld [vmem:[%s4076_s11 + $0x8] sm:$0xff]  }
 0x3e9   : > { %v1292_v22 = vpop.f32.mrf.mxu1  ;;  %v1337_v23 = vpop.f32.mrf.mxu0 }
 0x3ea   : > { %v1346_v24 = vmul.f32 0.35355338, %v1337_v23  ;;  %v1363_v25 = vsel %vm1152_vm3, %v1355_v21, -inf }
 0x3eb   : > { %v3147_v26 = vpop.f32.mrf.mxu0  ;;  %1364 = vmax.xlane.f32.xlu0 %v1363_v25  ;;  %v3142_v27 = vpop.f32.mrf.mxu1 }
 0x3ec   : > { %v1356_v28 = vadd.f32 %v3684_v1, %v1346_v24 }
 0x3ed   : > { %v1340_v29 = vpop.f32.mrf.mxu0 }
 0x3ee   : > { %v1366_v30 = vsel %vm1152_vm3, %v1356_v28, -inf }
 0x3ef   : > { %v3148_v31 = vpop.f32.mrf.mxu0  ;;  %1367 = vmax.xlane.f32.xlu1 %v1366_v30 }
 0x400   : > { %1454 = vrot.lane.b32.xlu1 %v3643_v51, %s4040_s2 }
 0x401   : > { %1405 = vrot.lane.b32.xlu0 %v3633_v48, %s4040_s2 }
 0x405   : > { %v1359_v32 = vpop.xlane.xlu1 %1358 }
 0x406   : > { %v1369_v33 = vsub.f32 %v1353_v6, %v1359_v32 }
 0x408   : > { %v1373_v34 = vmul.f32 1.442695, %v1369_v33 }
 0x40a   : > { %3343 = vpow2.f32 %v1373_v34 }
 0x417   : > { %v3344_v35 = vpop.eup %3343 }
 0x418   : > { %v1381_v36 = vsel %vm1152_vm3, %v3344_v35, 0.0 }
 0x420   : > { %1382 = vadd.xlane.f32.xlu0 %v1381_v36 }
 0x470   : > { %v1362_v37 = vpop.xlane.xlu0 %1361 }
 0x471   : > { %v1370_v38 = vsub.f32 %v1354_v14, %v1362_v37 }
 0x473   : > { %v1375_v39 = vmul.f32 1.442695, %v1370_v38 }
 0x474   : > { %v1365_v41 = vpop.xlane.xlu0 %1364 }
 0x475   : > { %3345 = vpow2.f32 %v1375_v39  ;;  %v1371_v42 = vsub.f32 %v1355_v21, %v1365_v41  ;;  %v3324_v21 = vld [vmem:[%s4076_s11] sm:$0xff]  }
 0x477   : > { %v1377_v43 = vmul.f32 1.442695, %v1371_v42  ;;  %v2951_v42 = vld [vmem:[%s4018_s13] ss:$0 sm:$0xff] }
 0x478   : > { %v1368_v44 = vpop.xlane.xlu1 %1367  ;;  %v1406_v45 = vpop.permute.xlu0 %1405 }
 0x479   : > { %3347 = vpow2.f32 %v1377_v43  ;;  %v1372_v46 = vsub.f32 %v1356_v28, %v1368_v44  ;;  %v1412_v47 = vsel %vm1410_vm4, %v1406_v45, 0 }
 0x47a   : > { %3150 = vmatpush3.bf16.msra.mxu1 %v1412_v47 }
 0x47b   : > { %v1379_v48 = vmul.f32 1.442695, %v1372_v46  ;;  %3161 = vmatprep.subr.bf16.mxu1 %v3394_v3 }
 0x47c   : > { %v1455_v49 = vpop.permute.xlu1 %1454 }
 0x47d   : > { %3349 = vpow2.f32 %v1379_v48  ;;  %v1460_v50 = vsel %vm1410_vm4, %v1455_v49, 0 }
 0x47e   : > { %3156 = vmatpush3.bf16.msra.mxu0 %v1460_v50 }
 0x47f   : > { %3167 = vmatprep.subr.bf16.mxu0 %v3394_v3 }
 0x482   : > { %v3346_v51 = vpop.eup %3345 }
 0x483   : > { %v1384_v54 = vsel %vm1152_vm3, %v3346_v51, 0.0 }
 0x484   : > { %1385 = vadd.xlane.f32.xlu1 %v1384_v54 }
 0x486   : > { %v3348_v55 = vpop.eup %3347 }
 0x487   : > { %v1387_v56 = vsel %vm1152_vm3, %v3348_v55, 0.0 }
 0x488   : > { %1388 = vadd.xlane.f32.xlu0 %v1387_v56 }
 0x48a   : > { %v3350_v57 = vpop.eup %3349 }
 0x48b   : > { %v1390_v58 = vsel %vm1152_vm3, %v3350_v57, 0.0 }
 0x48c   : > { %1391 = vadd.xlane.f32.xlu1 %v1390_v58  ;;  %v3327_v58 = vld [vmem:[%s4023_s18 + $0x18] sm:$0xff]  }
 0x49d   : > { %1502 = vrot.lane.b32.xlu1 %v3649_v53, %s4040_s2 }
 0x49e   : > { %1550 = vrot.lane.b32.xlu0 %v3647_v52, %s4040_s2  ;;  %s4046_s2 = smov 8  }
 0x4a9   : > { %v1383_v59 = vpop.xlane.xlu0 %1382 }
 0x4aa   : > { %3351 = vrcp.f32 %v1383_v59  ;;  %v3328_v59 = vld [vmem:[%s4023_s18 + $0x10] sm:$0xff]  }
 0x4b7   : > { %v3352_v60 = vpop.eup %3351 }
 0x4b8   : > { %v1397_v61 = vmul.f32 %v3352_v60, %v3344_v35 }
 0x4ba   : > { %v1401_v62 = vpack.c.bf16 %v1397_v61, %v1397_v61 }
 0x4bc   : > { %3152 = vmatmul.mubr.msk.bf16.vlgmr.msra.gmra.mxu1 %vm1152_vm3, %v1401_v62 }
 0x4bd   : > { %3163 = vmatprep.mubr.msk.bf16.mxu1 %vm3396_vm0, %v3394_v3 }
 0x50d   : > { %v1386_v63 = vpop.xlane.xlu1 %1385 }
 0x50e   : > { %3353 = vrcp.f32 %v1386_v63 }
 0x511   : > { %v1389_v0 = vpop.xlane.xlu0 %1388 }
 0x512   : > { %3355 = vrcp.f32 %v1389_v0  ;;  %v2955_v0 = vld [vmem:[%s4019_s14] ss:$0 sm:$0xff] }
 0x515   : > { %v1392_v2 = vpop.xlane.xlu1 %1391  ;;  %v1551_v6 = vpop.permute.xlu0 %1550 }
 0x516   : > { %3357 = vrcp.f32 %v1392_v2  ;;  %v1556_v9 = vsel %vm1410_vm4, %v1551_v6, 0  ;;  %v3329_v6 = vld [vmem:[%s4023_s18 + $0x8] sm:$0xff]  }
 0x519   : > { %v1503_v53 = vpop.permute.xlu1 %1502 }
 0x51a   : > { %v1508_v4 = vsel %vm1410_vm4, %v1503_v53, 0  ;;  %v2956_v53 = vld [vmem:[%s4020_s15] ss:$0 sm:$0xff] }
 0x51b   : > { %v3354_v52 = vpop.eup %3353  ;;  %3162 = vmatpush3.bf16.msra.mxu1 %v1508_v4 }
 0x51c   : > { %v1398_v5 = vmul.f32 %v3354_v52, %v3346_v51  ;;  %3173 = vmatprep.subr.bf16.mxu1 %v3394_v3 }
 0x51e   : > { %v1402_v7 = vpack.c.bf16 %v1398_v5, %v1398_v5 }
 0x51f   : > { %v3356_v8 = vpop.eup %3355 }
 0x520   : > { %3158 = vmatmul.mubr.msk.bf16.vlgmr.msra.gmra.mxu0 %vm1152_vm3, %v1402_v7  ;;  %v1399_v10 = vmul.f32 %v3356_v8, %v3348_v55  ;;  %v3330_v7 = vld [vmem:[%s4023_s18] sm:$0xff]  }
 0x521   : > { %3168 = vmatpush3.bf16.msra.mxu0 %v1556_v9  ;;  %3169 = vmatprep.mubr.msk.bf16.mxu0 %vm3396_vm0, %v3394_v3  ;;  %v2957_v8 = vld [vmem:[%s4022_s17] ss:$0 sm:$0xff] }
 0x522   : > { %v1403_v11 = vpack.c.bf16 %v1399_v10, %v1399_v10  ;;  %3181 = vmatprep.subr.bf16.mxu0 %v3394_v3 }
 0x523   : > { %v3358_v12 = vpop.eup %3357 }
 0x524   : > { %3164 = vmatmul.mubr.msk.bf16.vlgmr.msra.gmra.mxu1 %vm1152_vm3, %v1403_v11  ;;  %v1400_v14 = vmul.f32 %v3358_v12, %v3350_v57  ;;  %v3325_v57 = vld [vmem:[%s4021_s16 + $0x8] sm:$0xff]  }
 0x525   : > { %3177 = vmatprep.mubr.msk.bf16.mxu1 %vm3396_vm0, %v3394_v3  ;;  %3174 = vmatpush3.bf16.msra.mxu1 %v3323_v20 }
 0x526   : > { %v1404_v15 = vpack.c.bf16 %v1400_v14, %v1400_v14  ;;  %3175 = vmatprep.subr.bf16.mxu1 %v3394_v3 }
 0x528   : > { %3170 = vmatmul.mubr.msk.bf16.vlgmr.msra.gmra.mxu0 %vm1152_vm3, %v1404_v15 }
 0x529   : > { %3185 = vmatprep.mubr.msk.bf16.mxu0 %vm3396_vm0, %v3394_v3  ;;  %3176 = vmatpush3.bf16.msra.mxu1 %v3324_v21 }
 0x52a   : > { %3189 = vmatprep.subr.bf16.mxu1 %v3394_v3  ;;  %3182 = vmatpush3.bf16.msra.mxu0 %v3325_v57 }
 0x52b   : > { %3183 = vmatprep.subr.bf16.mxu0 %v3394_v3 }
 0x57c   : > { %v1448_v16 = vpop.f32.mrf.mxu1 }
 0x57e   : > { %v3153_v17 = vpop.f32.mrf.mxu1 }
 0x57f   : > { %v2961_v17 = vld [vmem:[%s4024_s19] ss:$0 sm:$0xff] }
 0x580   : > { %v1451_v18 = vpop.f32.mrf.mxu1 }
 0x582   : > { %v3154_v19 = vpop.f32.mrf.mxu1 }
 0x5e0   : > { %v1496_v22 = vpop.f32.mrf.mxu0 }
 0x5e1   : > { %1599 = vrot.lane.b32.xlu1 %v1496_v22, %s4046_s2  ;;  %s4084_s2 = sld [smem:[#allocation7_spill]] }
 0x5e2   : > { %v3159_v23 = vpop.f32.mrf.mxu0 }
 0x5e4   : > { %v1499_v24 = vpop.f32.mrf.mxu0  ;;  %v1544_v25 = vpop.f32.mrf.mxu1 }
 0x5e5   : > { %1603 = vrot.lane.b32.xlu0 %v1544_v25, %s4045_s3 }
 0x5e6   : > { %v3160_v26 = vpop.f32.mrf.mxu0  ;;  %v3165_v27 = vpop.f32.mrf.mxu1 }
 0x5e7   : > { %s896_s1 = scalar_lea.vmem %s4084_s2, %s3567_s10 }
 0x5e8   : > { %v1547_v28 = vpop.f32.mrf.mxu1  ;;  %v1592_v29 = vpop.f32.mrf.mxu0 }
 0x5e9   : > { %1607 = vrot.lane.b32.xlu1 %v1592_v29, %s4044_s7  ;;  %s4079_s7 = smov 96  }
 0x5ea   : > { %v3166_v30 = vpop.f32.mrf.mxu1  ;;  %v3171_v31 = vpop.f32.mrf.mxu0 }
 0x5eb   : > { %v3331_v30 = vld [vmem:[%s4072_s5 + $0x18] sm:$0xff]   ;;  %v3332_v31 = vld [vmem:[%s4072_s5 + $0x10] sm:$0xff]  }
 0x5ec   : > { %v1595_v32 = vpop.f32.mrf.mxu0 }
 0x5ee   : > { %v3172_v33 = vpop.f32.mrf.mxu0 }
 0x653   : > { %v1600_v34 = vpop.permute.xlu1 %1599 }
 0x654   : > { %v1610_v36 = vsel %vm1152_vm3, %v1448_v16, %v1600_v34 }
 0x657   : > { %v1604_v35 = vpop.permute.xlu0 %1603 }
 0x658   : > { %v1612_v37 = vsel %vm1611_vm5, %v1610_v36, %v1604_v35  ;;  %v2967_v36 = vld [vmem:[%s4025_s20] ss:$0 sm:$0xff] }
 0x65b   : > { %v1608_v38 = vpop.permute.xlu1 %1607 }
 0x65c   : > { %v1614_v39 = vsel %vm1613_vm6, %v1612_v37, %v1608_v38  ;;  %v2968_v38 = vld [vmem:[%s4026_s21] ss:$0 sm:$0xff] }
 0x65d   : > { %v1615_v41 = vpack.c.bf16 %v1614_v39, %v1614_v39 }
 0x65f   : > { %3178 = vmatmul.mubr.msk.bf16.vlgmr.msra.gmra.mxu1 %vm973_vm2, %v1615_v41 }
 0x660   : > { %3197 = vmatprep.mubr.msk.bf16.mxu1 %vm3396_vm0, %v3394_v3  ;;  %3190 = vmatpush3.bf16.msra.mxu1 %v3327_v58 }
 0x661   : > { %3191 = vmatprep.subr.bf16.mxu1 %v3394_v3 }
 0x664   : > { %3192 = vmatpush3.bf16.msra.mxu1 %v3328_v59 }
 0x665   : > { %3193 = vmatprep.subr.bf16.mxu1 %v3394_v3 }
 0x668   : > { %3194 = vmatpush3.bf16.msra.mxu1 %v3329_v6 }
 0x669   : > { %3195 = vmatprep.subr.bf16.mxu1 %v3394_v3 }
 0x66c   : > { %3196 = vmatpush3.bf16.msra.mxu1 %v3330_v7 }
 0x66d   : > { %3215 = vmatprep.subr.bf16.mxu1 %v3394_v3 }
 0x71f   : > { %v1676_v43 = vpop.f32.mrf.mxu1 }
 0x720   : > { %v1677_v44 = vadd.f32 %v2951_v42, %v1676_v43  ;;  %v2974_v43 = vld [vmem:[%s4074_s12 + $0x1] ss:$0 sm:$0xff] }
 0x721   : > { %v3179_v45 = vpop.f32.mrf.mxu1 }
 0x722   : > { %v1682_v46 = vadd.f32 %v1677_v44, %v3623_v40  ;;  %v3326_v40 = vld [vmem:[%s4021_s16] sm:$0xff]  }
 0x723   : > { %v1679_v47 = vpop.f32.mrf.mxu1  ;;  %3184 = vmatpush3.bf16.msra.mxu0 %v3326_v40 }
 0x724   : > { %v1685_v48 = vsel %vm973_vm2, %v1682_v46, 0.0  ;;  %3201 = vmatprep.subr.bf16.mxu0 %v3394_v3 }
 0x725   : > { %1686 = vadd.xlane.f32.xlu0 %v1685_v48  ;;  %v3180_v49 = vpop.f32.mrf.mxu1 }
 0x7ae   : > { %v1687_v50 = vpop.xlane.xlu0 %1686 }
 0x7af   : > { %v1689_v51 = vmul.f32 0.03125, %v1687_v50 }
 0x7b1   : > { %v1690_v54 = vsub.f32 %v1682_v46, %v1689_v51 }
 0x7b3   : > { %v1691_v55 = vmul.f32 %v1690_v54, %v1690_v54 }
 0x7b5   : > { %v1692_v56 = vsel %vm973_vm2, %v1691_v55, 0.0 }
 0x7b6   : > { %1693 = vadd.xlane.f32.xlu1 %v1692_v56 }
 0x83f   : > { %v1694_v60 = vpop.xlane.xlu1 %1693 }
 0x840   : > { %v1695_v61 = vmul.f32 0.03125, %v1694_v60 }
 0x842   : > { %v1696_v62 = vadd.f32 1e-05, %v1695_v61 }
 0x844   : > { %3359 = vrsqrt.f32 %v1696_v62 }
 0x851   : > { %v3360_v63 = vpop.eup %3359 }
 0x852   : > { %v1698_v2 = vmul.f32 %v3360_v63, %v1690_v54 }
 0x854   : > { %v1705_v4 = vmul.f32 %v2955_v0, %v1698_v2 }
 0x856   : > { %v1712_v52 = vadd.f32 %v2956_v53, %v1705_v4 }
 0x858   : > { %v1713_v5 = vpack.c.bf16 %v1712_v52, %v1712_v52 }
 0x85a   : > { %3186 = vmatmul.mubr.msk.bf16.vlgmr.msra.gmra.mxu0 %vm973_vm2, %v1713_v5 }
 0x85b   : > { %3205 = vmatprep.mubr.msk.bf16.mxu0 %vm3396_vm0, %v3394_v3  ;;  %3202 = vmatpush3.bf16.msra.mxu0 %v3331_v30 }
 0x85c   : > { %3203 = vmatprep.subr.bf16.mxu0 %v3394_v3 }
 0x85f   : > { %3204 = vmatpush3.bf16.msra.mxu0 %v3332_v31 }
 0x860   : > { %3209 = vmatprep.subr.bf16.mxu0 %v3394_v3 }
 0x91a   : > { %v1774_v9 = vpop.f32.mrf.mxu0 }
 0x91b   : > { %v1775_v10 = vadd.f32 %v2957_v8, %v1774_v9 }
 0x91c   : > { %v3187_v11 = vpop.f32.mrf.mxu0 }
 0x91d   : > { %v1780_v12 = vmax.f32 %v1775_v10, 0.0 }
 0x91e   : > { %v1777_v14 = vpop.f32.mrf.mxu0 }
 0x91f   : > { %v1781_v15 = vpack.c.bf16 %v1780_v12, %v1780_v12 }
 0x920   : > { %v3188_v16 = vpop.f32.mrf.mxu0 }
 0x921   : > { %3198 = vmatmul.mubr.msk.bf16.vlgmr.msra.gmra.mxu1 %vm1821_vm7, %v1781_v15 }
 0x922   : > { %3217 = vmatprep.mubr.msk.bf16.mxu1 %vm3396_vm0, %v3394_v3 }
 0x9e1   : > { %v1859_v18 = vpop.f32.mrf.mxu1 }
 0x9e2   : > { %v1860_v19 = vadd.f32 %v2961_v17, %v1859_v18 }
 0x9e3   : > { %v3199_v20 = vpop.f32.mrf.mxu1 }
 0x9e4   : > { %v1865_v21 = vadd.f32 %v1860_v19, %v1712_v52 }
 0x9e5   : > { %v1862_v22 = vpop.f32.mrf.mxu1 }
 0x9e6   : > { %v1868_v23 = vsel %vm973_vm2, %v1865_v21, 0.0 }
 0x9e7   : > { %1869 = vadd.xlane.f32.xlu0 %v1868_v23  ;;  %v3200_v24 = vpop.f32.mrf.mxu1 }
 0xa70   : > { %v1870_v25 = vpop.xlane.xlu0 %1869 }
 0xa71   : > { %v1871_v26 = vmul.f32 0.03125, %v1870_v25 }
 0xa73   : > { %v1872_v27 = vsub.f32 %v1865_v21, %v1871_v26 }
 0xa75   : > { %v1873_v28 = vmul.f32 %v1872_v27, %v1872_v27 }
 0xa77   : > { %v1874_v29 = vsel %vm973_vm2, %v1873_v28, 0.0 }
 0xa78   : > { %1875 = vadd.xlane.f32.xlu0 %v1874_v29 }
 0xb01   : > { %v1876_v32 = vpop.xlane.xlu0 %1875 }
 0xb02   : > { %v1877_v33 = vmul.f32 0.03125, %v1876_v32 }
 0xb04   : > { %v1878_v34 = vadd.f32 1e-05, %v1877_v33 }
 0xb06   : > { %3361 = vrsqrt.f32 %v1878_v34 }
 0xb13   : > { %v3362_v35 = vpop.eup %3361 }
 0xb14   : > { %v1880_v37 = vmul.f32 %v3362_v35, %v1872_v27 }
 0xb16   : > { %v1887_v39 = vmul.f32 %v2967_v36, %v1880_v37 }
 0xb18   : > { %v3807_v41 = vadd.f32 %v2968_v38, %v1887_v39 }
 0xb1a   : > { %v1895_v42 = vpack.c.bf16 %v3807_v41, %v3807_v41 }
 0xb1c   : > { %3206 = vmatmul.mubr.msk.bf16.vlgmr.msra.gmra.mxu0 %vm973_vm2, %v1895_v42 }
 0xb1d   : > { %3211 = vmatprep.mubr.msk.bf16.mxu0 %vm3396_vm0, %v3394_v3 }
 0xbdc   : > { %v1958_v44 = vpop.f32.mrf.mxu0 }
 0xbdd   : > { %v1959_v45 = vadd.f32 %v2974_v43, %v1958_v44 }
 0xbde   : > { %v3207_v46 = vpop.f32.mrf.mxu0 }
 0xbdf   : > { %v3817_v47 = vpack.c.bf16 %v1959_v45, %v1959_v45 }
 0xbe0   : > { %v1961_v48 = vpop.f32.mrf.mxu0 }
 0xbe1   : > { %1968 = vrot.lane.b32.xlu0 %v3817_v47, %s3399_s8  ;;  %1966 = vrot.lane.b32.xlu1 %v3817_v47, %s4077_s0  ;;  %s4080_s8 = smov 64   ;;  %s4082_s0 = smov 16  }
 0xbe2   : > { %v3208_v49 = vpop.f32.mrf.mxu0 }
 0xbe5   : > { %1970 = vrot.lane.b32.xlu1 %v3817_v47, %s4078_s9  ;;  %s4083_s9 = smov 24  }
 0xbe9   : > { %1972 = vrot.lane.b32.xlu1 %v3817_v47, %s4079_s7 }
 0xc53   : > { %v3827_v50 = vpop.permute.xlu0 %1968  ;;  %v1967_v51 = vpop.permute.xlu1 %1966 }
 0xc54   : > { %2068 = vrot.lane.b32.xlu1 %v3827_v50, %s4079_s7  ;;  %2020 = vrot.lane.b32.xlu0 %v1967_v51, %s4079_s7 }
 0xc57   : > { %v3832_v54 = vpop.permute.xlu1 %1970 }
 0xc58   : > { %2116 = vrot.lane.b32.xlu0 %v3832_v54, %s4079_s7 }
 0xc5b   : > { %v1973_v55 = vpop.permute.xlu1 %1972 }
 0xc5c   : > { %v1978_v56 = vsel %vm1152_vm3, %v1973_v55, 0 }
 0xc5d   : > { %3210 = vmatpush3.bf16.xpose.msra.mxu0 %v1978_v56 }
 0xc5e   : > { %3221 = vmatprep.subr.bf16.mxu0 %v3394_v3 }
 0xc64   : > { %3212 = vmatmul.mubr.msk.bf16.vlgmr.msra.gmra.mxu0 %vm1152_vm3, %v3817_v47 }
 0xc65   : > { %3223 = vmatprep.mubr.msk.bf16.mxu0 %vm3396_vm0, %v3394_v3 }
 0xcc6   : > { %v2021_v57 = vpop.permute.xlu0 %2020  ;;  %v2069_v40 = vpop.permute.xlu1 %2068 }
 0xcc7   : > { %v2026_v58 = vsel %vm1152_vm3, %v2021_v57, 0  ;;  %v2074_v59 = vsel %vm1152_vm3, %v2069_v40, 0 }
 0xcc8   : > { %3216 = vmatpush3.bf16.xpose.msra.mxu1 %v2026_v58  ;;  %3222 = vmatpush3.bf16.xpose.msra.mxu0 %v2074_v59 }
 0xcc9   : > { %3227 = vmatprep.subr.bf16.mxu1 %v3394_v3  ;;  %3233 = vmatprep.subr.bf16.mxu0 %v3394_v3 }
 0xcca   : > { %v2117_v60 = vpop.permute.xlu0 %2116 }
 0xccb   : > { %v2122_v61 = vsel %vm1152_vm3, %v2117_v60, 0 }
 0xccf   : > { %3218 = vmatmul.mubr.msk.bf16.vlgmr.msra.gmra.mxu1 %vm1152_vm3, %v1967_v51  ;;  %3224 = vmatmul.mubr.msk.bf16.vlgmr.msra.gmra.mxu0 %vm1152_vm3, %v3827_v50 }
 0xcd0   : > { %3228 = vmatpush3.bf16.xpose.msra.mxu1 %v2122_v61  ;;  %3229 = vmatprep.mubr.msk.bf16.mxu1 %vm3396_vm0, %v3394_v3 }
 0xcd1   : > { %3239 = vmatprep.subr.bf16.mxu1 %v3394_v3  ;;  %3235 = vmatprep.mubr.msk.bf16.mxu0 %vm3396_vm0, %v3394_v3 }
 0xcd7   : > { %3230 = vmatmul.mubr.msk.bf16.vlgmr.msra.gmra.mxu1 %vm1152_vm3, %v3832_v54 }
 0xcd8   : > { %3241 = vmatprep.mubr.msk.bf16.mxu1 %vm3396_vm0, %v3394_v3 }
 0xd24   : > { %v2014_v62 = vpop.f32.mrf.mxu0 }
 0xd25   : > { %v2164_v63 = vmul.f32 0.35355338, %v2014_v62 }
 0xd26   : > { %v3213_v0 = vpop.f32.mrf.mxu0 }
 0xd27   : > { %v2168_v2 = vadd.f32 %v2164_v63, %v3684_v1 }
 0xd28   : > { %v2017_v53 = vpop.f32.mrf.mxu0 }
 0xd29   : > { %v2172_v4 = vsel %vm1152_vm3, %v2168_v2, -inf }
 0xd2a   : > { %2173 = vmax.xlane.f32.xlu1 %v2172_v4  ;;  %v3214_v52 = vpop.f32.mrf.mxu0 }
 0xd8f   : > { %v2062_v5 = vpop.f32.mrf.mxu1  ;;  %v2110_v6 = vpop.f32.mrf.mxu0 }
 0xd90   : > { %v2165_v7 = vmul.f32 0.35355338, %v2062_v5  ;;  %v2166_v8 = vmul.f32 0.35355338, %v2110_v6 }
 0xd91   : > { %v3219_v9 = vpop.f32.mrf.mxu1  ;;  %v3225_v10 = vpop.f32.mrf.mxu0 }
 0xd92   : > { %v2169_v11 = vadd.f32 %v2165_v7, %v3684_v1  ;;  %v2170_v16 = vadd.f32 %v2166_v8, %v3684_v1 }
 0xd93   : > { %v2065_v12 = vpop.f32.mrf.mxu1  ;;  %v2113_v14 = vpop.f32.mrf.mxu0 }
 0xd94   : > { %v2175_v15 = vsel %vm1152_vm3, %v2169_v11, -inf  ;;  %v2178_v21 = vsel %vm1152_vm3, %v2170_v16, -inf  ;;  %v3333_v14 = vld [vmem:[%s4076_s11 + $0x18] sm:$0xff]  }
 0xd95   : > { %v3226_v17 = vpop.f32.mrf.mxu0  ;;  %2176 = vmax.xlane.f32.xlu0 %v2175_v15  ;;  %v3220_v18 = vpop.f32.mrf.mxu1  ;;  %v3334_v15 = vld [vmem:[%s4076_s11 + $0x10] sm:$0xff]  }
 0xd97   : > { %v2158_v19 = vpop.f32.mrf.mxu1 }
 0xd98   : > { %v2167_v20 = vmul.f32 0.35355338, %v2158_v19 }
 0xd99   : > { %2179 = vmax.xlane.f32.xlu0 %v2178_v21  ;;  %v3231_v22 = vpop.f32.mrf.mxu1 }
 0xd9a   : > { %v2171_v23 = vadd.f32 %v2167_v20, %v3684_v1 }
 0xd9b   : > { %v2161_v24 = vpop.f32.mrf.mxu1 }
 0xd9c   : > { %v2181_v25 = vsel %vm1152_vm3, %v2171_v23, -inf }
 0xd9d   : > { %2182 = vmax.xlane.f32.xlu1 %v2181_v25  ;;  %v3232_v26 = vpop.f32.mrf.mxu1 }
 0xdae   : > { %2268 = vrot.lane.b32.xlu1 %v1967_v51, %s4080_s8 }
 0xdaf   : > { %2220 = vrot.lane.b32.xlu0 %v3817_v47, %s4080_s8 }
 0xdb3   : > { %v2174_v27 = vpop.xlane.xlu1 %2173 }
 0xdb4   : > { %v2184_v28 = vsub.f32 %v2168_v2, %v2174_v27 }
 0xdb6   : > { %v2188_v29 = vmul.f32 1.442695, %v2184_v28 }
 0xdb8   : > { %3363 = vpow2.f32 %v2188_v29 }
 0xdc5   : > { %v3364_v30 = vpop.eup %3363 }
 0xdc6   : > { %v2196_v31 = vsel %vm1152_vm3, %v3364_v30, 0.0 }
 0xdce   : > { %2197 = vadd.xlane.f32.xlu0 %v2196_v31 }
 0xe1e   : > { %v2177_v32 = vpop.xlane.xlu0 %2176 }
 0xe1f   : > { %v2185_v1 = vsub.f32 %v2169_v11, %v2177_v32 }
 0xe21   : > { %v2190_v33 = vmul.f32 1.442695, %v2185_v1 }
 0xe22   : > { %v2180_v34 = vpop.xlane.xlu0 %2179 }
 0xe23   : > { %3365 = vpow2.f32 %v2190_v33  ;;  %v2186_v35 = vsub.f32 %v2170_v16, %v2180_v34  ;;  %v2991_v34 = vld [vmem:[%s4018_s13 + $0x1] ss:$0 sm:$0xff] }
 0xe25   : > { %v2192_v36 = vmul.f32 1.442695, %v2186_v35 }
 0xe26   : > { %v2221_v37 = vpop.permute.xlu0 %2220  ;;  %v2183_v38 = vpop.xlane.xlu1 %2182 }
 0xe27   : > { %3367 = vpow2.f32 %v2192_v36  ;;  %v2226_v39 = vsel %vm1410_vm4, %v2221_v37, 0  ;;  %v2187_v42 = vsub.f32 %v2171_v23, %v2183_v38 }
 0xe28   : > { %3234 = vmatpush3.bf16.msra.mxu0 %v2226_v39 }
 0xe29   : > { %v2194_v43 = vmul.f32 1.442695, %v2187_v42  ;;  %3245 = vmatprep.subr.bf16.mxu0 %v3394_v3 }
 0xe2a   : > { %v2269_v44 = vpop.permute.xlu1 %2268 }
 0xe2b   : > { %3369 = vpow2.f32 %v2194_v43  ;;  %v2274_v45 = vsel %vm1410_vm4, %v2269_v44, 0 }
 0xe2c   : > { %3240 = vmatpush3.bf16.msra.mxu1 %v2274_v45 }
 0xe2d   : > { %3251 = vmatprep.subr.bf16.mxu1 %v3394_v3 }
 0xe30   : > { %v3366_v46 = vpop.eup %3365 }
 0xe31   : > { %v2199_v47 = vsel %vm1152_vm3, %v3366_v46, 0.0 }
 0xe32   : > { %2200 = vadd.xlane.f32.xlu1 %v2199_v47 }
 0xe34   : > { %v3368_v48 = vpop.eup %3367 }
 0xe35   : > { %v2202_v49 = vsel %vm1152_vm3, %v3368_v48, 0.0 }
 0xe36   : > { %2203 = vadd.xlane.f32.xlu0 %v2202_v49  ;;  %v2715_v49 = vld [vmem:[%s896_s1] sm:$0xff] }
 0xe38   : > { %v3370_v51 = vpop.eup %3369 }
 0xe39   : > { %v2205_v55 = vsel %vm1152_vm3, %v3370_v51, 0.0 }
 0xe3a   : > { %2206 = vadd.xlane.f32.xlu1 %v2205_v55  ;;  %v3336_v55 = vld [vmem:[%s4021_s16 + $0x10] sm:$0xff]  }
 0xe4b   : > { %2316 = vrot.lane.b32.xlu1 %v3827_v50, %s4080_s8 }
 0xe4c   : > { %2364 = vrot.lane.b32.xlu0 %v3832_v54, %s4080_s8 }
 0xe57   : > { %v2198_v56 = vpop.xlane.xlu0 %2197 }
 0xe58   : > { %3371 = vrcp.f32 %v2198_v56  ;;  %v3337_v56 = vld [vmem:[%s4023_s18 + $0x38] sm:$0xff]  }
 0xe65   : > { %v3372_v57 = vpop.eup %3371 }
 0xe66   : > { %v2212_v40 = vmul.f32 %v3372_v57, %v3364_v30  ;;  %v3338_v57 = vld [vmem:[%s4023_s18 + $0x30] sm:$0xff]  }
 0xe68   : > { %v2216_v58 = vpack.c.bf16 %v2212_v40, %v2212_v40 }
 0xe6a   : > { %3236 = vmatmul.mubr.msk.bf16.vlgmr.msra.gmra.mxu0 %vm1152_vm3, %v2216_v58 }
 0xe6b   : > { %3247 = vmatprep.mubr.msk.bf16.mxu0 %vm3396_vm0, %v3394_v3 }
 0xebb   : > { %v2201_v59 = vpop.xlane.xlu1 %2200 }
 0xebc   : > { %3373 = vrcp.f32 %v2201_v59 }
 0xebf   : > { %v2204_v60 = vpop.xlane.xlu0 %2203 }
 0xec0   : > { %3375 = vrcp.f32 %v2204_v60 }
 0xec3   : > { %v2207_v61 = vpop.xlane.xlu1 %2206  ;;  %v2365_v0 = vpop.permute.xlu0 %2364 }
 0xec4   : > { %3377 = vrcp.f32 %v2207_v61  ;;  %v2370_v4 = vsel %vm1410_vm4, %v2365_v0, 0  ;;  %v2997_v61 = vld [vmem:[%s4019_s14 + $0x1] ss:$0 sm:$0xff] }
 0xec7   : > { %v2317_v50 = vpop.permute.xlu1 %2316 }
 0xec8   : > { %v2322_v62 = vsel %vm1410_vm4, %v2317_v50, 0 }
 0xec9   : > { %v3374_v54 = vpop.eup %3373  ;;  %3246 = vmatpush3.bf16.msra.mxu0 %v2322_v62  ;;  %v2998_v62 = vld [vmem:[%s4020_s15 + $0x1] ss:$0 sm:$0xff] }
 0xeca   : > { %v2213_v63 = vmul.f32 %v3374_v54, %v3366_v46  ;;  %3257 = vmatprep.subr.bf16.mxu0 %v3394_v3 }
 0xecc   : > { %v2217_v2 = vpack.c.bf16 %v2213_v63, %v2213_v63 }
 0xecd   : > { %v3376_v53 = vpop.eup %3375 }
 0xece   : > { %3242 = vmatmul.mubr.msk.bf16.vlgmr.msra.gmra.mxu1 %vm1152_vm3, %v2217_v2  ;;  %v2214_v52 = vmul.f32 %v3376_v53, %v3368_v48  ;;  %v3339_v2 = vld [vmem:[%s4023_s18 + $0x28] sm:$0xff]   ;;  %v3340_v53 = vld [vmem:[%s4023_s18 + $0x20] sm:$0xff]  }
 0xecf   : > { %3252 = vmatpush3.bf16.msra.mxu1 %v2370_v4  ;;  %3253 = vmatprep.mubr.msk.bf16.mxu1 %vm3396_vm0, %v3394_v3  ;;  %v3004_v4 = vld [vmem:[%s4022_s17 + $0x1] ss:$0 sm:$0xff] }
 0xed0   : > { %v2218_v5 = vpack.c.bf16 %v2214_v52, %v2214_v52  ;;  %3265 = vmatprep.subr.bf16.mxu1 %v3394_v3 }
 0xed1   : > { %v3378_v6 = vpop.eup %3377 }
 0xed2   : > { %3248 = vmatmul.mubr.msk.bf16.vlgmr.msra.gmra.mxu0 %vm1152_vm3, %v2218_v5  ;;  %v2215_v7 = vmul.f32 %v3378_v6, %v3370_v51  ;;  %v3335_v51 = vld [vmem:[%s4021_s16 + $0x18] sm:$0xff]  }
 0xed3   : > { %3261 = vmatprep.mubr.msk.bf16.mxu0 %vm3396_vm0, %v3394_v3  ;;  %3258 = vmatpush3.bf16.msra.mxu0 %v3333_v14 }
 0xed4   : > { %v2219_v8 = vpack.c.bf16 %v2215_v7, %v2215_v7  ;;  %3259 = vmatprep.subr.bf16.mxu0 %v3394_v3 }
 0xed6   : > { %3254 = vmatmul.mubr.msk.bf16.vlgmr.msra.gmra.mxu1 %vm1152_vm3, %v2219_v8 }
 0xed7   : > { %3269 = vmatprep.mubr.msk.bf16.mxu1 %vm3396_vm0, %v3394_v3  ;;  %3260 = vmatpush3.bf16.msra.mxu0 %v3334_v15 }
 0xed8   : > { %3273 = vmatprep.subr.bf16.mxu0 %v3394_v3  ;;  %3266 = vmatpush3.bf16.msra.mxu1 %v3335_v51 }
 0xed9   : > { %3267 = vmatprep.subr.bf16.mxu1 %v3394_v3 }
 0xedc   : > { %3268 = vmatpush3.bf16.msra.mxu1 %v3336_v55 }
 0xedd   : > { %3285 = vmatprep.subr.bf16.mxu1 %v3394_v3 }
 0xf2a   : > { %v2262_v9 = vpop.f32.mrf.mxu0 }
 0xf2c   : > { %v3237_v10 = vpop.f32.mrf.mxu0 }
 0xf2e   : > { %v2265_v11 = vpop.f32.mrf.mxu0 }
 0xf2f   : > { %v3017_v11 = vld [vmem:[%s4024_s19 + $0x1] ss:$0 sm:$0xff] }
 0xf30   : > { %v3238_v12 = vpop.f32.mrf.mxu0 }
 0xf8e   : > { %v2310_v16 = vpop.f32.mrf.mxu1 }
 0xf8f   : > { %2413 = vrot.lane.b32.xlu1 %v2310_v16, %s4081_s4  ;;  %s902_s4 = scalar_lea.vmem %s4033_s28, %s4088_s30 }
 0xf90   : > { %v3243_v17 = vpop.f32.mrf.mxu1 }
 0xf92   : > { %v2313_v18 = vpop.f32.mrf.mxu1  ;;  %v2358_v19 = vpop.f32.mrf.mxu0 }
 0xf93   : > { %2417 = vrot.lane.b32.xlu0 %v2358_v19, %s4082_s0 }
 0xf94   : > { %v3244_v20 = vpop.f32.mrf.mxu1  ;;  %v3249_v21 = vpop.f32.mrf.mxu0 }
 0xf95   : > { %v2730_v20 = vsel %vm2729_vm8, %v2715_v49, 0.0 }
 0xf96   : > { %v2361_v22 = vpop.f32.mrf.mxu0  ;;  %v2406_v23 = vpop.f32.mrf.mxu1 }
 0xf97   : > { %2421 = vrot.lane.b32.xlu1 %v2406_v23, %s4083_s9  ;;  %s4085_s9 = sld [smem:[#allocation8_spill]]  ;;  %v2731_v23 = vrot.slane %v2730_v20, 4 }
 0xf98   : > { %v3250_v24 = vpop.f32.mrf.mxu0  ;;  %v3255_v25 = vpop.f32.mrf.mxu1 }
 0xf9a   : > { %v2409_v26 = vpop.f32.mrf.mxu1 }
 0xf9b   : > { %v2732_v26 = vadd.f32 %v2731_v23, %v2730_v20 }
 0xf9c   : > { %v3256_v27 = vpop.f32.mrf.mxu1 }
 0xf9d   : > { %s899_s7 = scalar_lea.vmem %s4085_s9, %s4088_s30 }
0x1001   : > { %v2414_v28 = vpop.permute.xlu1 %2413 }
0x1002   : > { %v2424_v30 = vsel %vm1152_vm3, %v2262_v9, %v2414_v28  ;;  %v2733_v28 = vrot.slane %v2732_v26, 2 }
0x1005   : > { %v2418_v29 = vpop.permute.xlu0 %2417 }
0x1006   : > { %v2425_v31 = vsel %vm1611_vm5, %v2424_v30, %v2418_v29  ;;  %v2734_v29 = vadd.f32 %v2733_v28, %v2732_v26 }
0x1008   : > { %v2735_v30 = vrot.slane %v2734_v29, 1 }
0x1009   : > { %v2422_v32 = vpop.permute.xlu1 %2421 }
0x100a   : > { %v2426_v1 = vsel %vm1613_vm6, %v2425_v31, %v2422_v32  ;;  %v2736_v31 = vadd.f32 %v2735_v30, %v2734_v29 }
0x100b   : > { %v2427_v33 = vpack.c.bf16 %v2426_v1, %v2426_v1  ;;  %v3341_v1 = vld [vmem:[%s4029_s24 + $0x8] sm:$0xff]  }
0x100c   : > { %v2737_v32 = vmax.f32 %v2736_v31, 1.0 }
0x100d   : > { %3262 = vmatmul.mubr.msk.bf16.vlgmr.msra.gmra.mxu0 %vm973_vm2, %v2427_v33  ;;  %v3342_v33 = vld [vmem:[%s4029_s24] sm:$0xff]  }
0x100e   : > { %3281 = vmatprep.mubr.msk.bf16.mxu0 %vm3396_vm0, %v3394_v3  ;;  %3274 = vmatpush3.bf16.msra.mxu0 %v3337_v56 }
0x100f   : > { %3275 = vmatprep.subr.bf16.mxu0 %v3394_v3 }
0x1012   : > { %3276 = vmatpush3.bf16.msra.mxu0 %v3338_v57 }
0x1013   : > { %3277 = vmatprep.subr.bf16.mxu0 %v3394_v3 }
0x1016   : > { %3278 = vmatpush3.bf16.msra.mxu0 %v3339_v2 }
0x1017   : > { %3279 = vmatprep.subr.bf16.mxu0 %v3394_v3 }
0x101a   : > { %3280 = vmatpush3.bf16.msra.mxu0 %v3340_v53 }
0x10cd   : > { %v2490_v35 = vpop.f32.mrf.mxu0 }
0x10ce   : > { %v2491_v36 = vadd.f32 %v2991_v34, %v2490_v35 }
0x10cf   : > { %v3263_v37 = vpop.f32.mrf.mxu0 }
0x10d0   : > { %v2496_v38 = vadd.f32 %v2491_v36, %v3807_v41  ;;  %v2745_v41 = vld [vmem:[%s899_s7] sm:$0x1] }
0x10d1   : > { %v2493_v39 = vpop.f32.mrf.mxu0 }
0x10d2   : > { %v2501_v42 = vsel %vm973_vm2, %v2496_v38, 0.0 }
0x10d3   : > { %2502 = vadd.xlane.f32.xlu0 %v2501_v42  ;;  %v3264_v43 = vpop.f32.mrf.mxu0  ;;  %v3026_v42 = vld [vmem:[%s4026_s21 + $0x1] ss:$0 sm:$0xff] }
0x115c   : > { %v2503_v44 = vpop.xlane.xlu0 %2502 }
0x115d   : > { %v2504_v45 = vmul.f32 0.03125, %v2503_v44 }
0x115f   : > { %v2505_v46 = vsub.f32 %v2496_v38, %v2504_v45  ;;  %v3025_v38 = vld [vmem:[%s4025_s20 + $0x1] ss:$0 sm:$0xff] }
0x1161   : > { %v2506_v47 = vmul.f32 %v2505_v46, %v2505_v46 }
0x1163   : > { %v2507_v48 = vsel %vm973_vm2, %v2506_v47, 0.0 }
0x1164   : > { %2508 = vadd.xlane.f32.xlu1 %v2507_v48 }
0x1175   : > { %2718 = vperm.xlu1 %3315, %v2715_v49  }
0x1179   : > { %2749 = vperm.xlu1 %3315, %v2745_v41  }
0x11ed   : > { %v2509_v40 = vpop.xlane.xlu1 %2508 }
0x11ee   : > { %v2510_v58 = vmul.f32 0.03125, %v2509_v40 }
0x11f0   : > { %v2511_v59 = vadd.f32 1e-05, %v2510_v58  ;;  %v2746_v58 = vld [vmem:[%s4027_s22] sm:$0x1] }
0x11f2   : > { %3379 = vrsqrt.f32 %v2511_v59 }
0x11ff   : > { %v3380_v60 = vpop.eup %3379 }
0x1200   : > { %v2513_v50 = vmul.f32 %v3380_v60, %v2505_v46  ;;  %v2719_v46 = vpop.permute.xlu1 %2718 }
0x1202   : > { %v2520_v54 = vmul.f32 %v2997_v61, %v2513_v50  ;;  %v2758_v50 = vld [vmem:[%s4028_s23] sm:$0x1] }
0x1204   : > { %v2527_v63 = vadd.f32 %v2998_v62, %v2520_v54  ;;  %v2750_v51 = vpop.permute.xlu1 %2749 }
0x1205   : > { %v2755_v56 = vrot.slane %v2750_v51, %v3596_v13  ;;  %v2765_v13 = vld [vmem:[%s4030_s25] sm:$0x1] }
0x1206   : > { %v2528_v0 = vpack.c.bf16 %v2527_v63, %v2527_v63 }
0x1207   : > { %v2756_v60 = vmul.f32 %v2755_v56, %v2746_v58 }
0x1208   : > { %3270 = vmatmul.mubr.msk.bf16.vlgmr.msra.gmra.mxu1 %vm973_vm2, %v2528_v0 }
0x1209   : > { %3289 = vmatprep.mubr.msk.bf16.mxu1 %vm3396_vm0, %v3394_v3  ;;  %3286 = vmatpush3.bf16.msra.mxu1 %v3341_v1 }
0x120a   : > { %3287 = vmatprep.subr.bf16.mxu1 %v3394_v3 }
0x120d   : > { %3288 = vmatpush3.bf16.msra.mxu1 %v3342_v33 }
0x12c8   : > { %v2591_v52 = vpop.f32.mrf.mxu1 }
0x12c9   : > { %v2592_v5 = vadd.f32 %v3004_v4, %v2591_v52  ;;  %v2822_v4 = vld [vmem:[%s4031_s26] sm:$0x1] }
0x12ca   : > { %v3271_v6 = vpop.f32.mrf.mxu1 }
0x12cb   : > { %v2597_v7 = vmax.f32 %v2592_v5, 0.0 }
0x12cc   : > { %v2594_v8 = vpop.f32.mrf.mxu1 }
0x12cd   : > { %v2598_v9 = vpack.c.bf16 %v2597_v7, %v2597_v7 }
0x12ce   : > { %v3272_v10 = vpop.f32.mrf.mxu1 }
0x12cf   : > { %3282 = vmatmul.mubr.msk.bf16.vlgmr.msra.gmra.mxu0 %vm1821_vm7, %v2598_v9  ;;  %v2828_v9 = vld [vmem:[#allocation2] sm:$0x1] }
0x138f   : > { %v2677_v12 = vpop.f32.mrf.mxu0 }
0x1390   : > { %v2678_v14 = vadd.f32 %v3017_v11, %v2677_v12 }
0x1391   : > { %v3283_v15 = vpop.f32.mrf.mxu0 }
0x1392   : > { %v2683_v16 = vadd.f32 %v2678_v14, %v2527_v63 }
0x1393   : > { %v2680_v17 = vpop.f32.mrf.mxu0 }
0x1394   : > { %v2688_v18 = vsel %vm973_vm2, %v2683_v16, 0.0 }
0x1395   : > { %2689 = vadd.xlane.f32.xlu0 %v2688_v18  ;;  %v3284_v19 = vpop.f32.mrf.mxu0 }
0x141e   : > { %v2690_v21 = vpop.xlane.xlu0 %2689 }
0x141f   : > { %v2691_v22 = vmul.f32 0.03125, %v2690_v21 }
0x1421   : > { %v2692_v24 = vsub.f32 %v2683_v16, %v2691_v22 }
0x1423   : > { %v2693_v25 = vmul.f32 %v2692_v24, %v2692_v24 }
0x1425   : > { %v2694_v27 = vsel %vm973_vm2, %v2693_v25, 0.0 }
0x1426   : > { %2695 = vadd.xlane.f32.xlu0 %v2694_v27 }
0x143c   : > { %2740 = vperm.xlu0 %3316, %v2737_v32  }
0x14af   : > { %v2696_v34 = vpop.xlane.xlu0 %2695 }
0x14b0   : > { %v2697_v35 = vmul.f32 0.03125, %v2696_v34 }
0x14b2   : > { %v2698_v36 = vadd.f32 1e-05, %v2697_v35 }
0x14b4   : > { %3381 = vrsqrt.f32 %v2698_v36 }
0x14b7   : > { %v2741_v44 = vpop.permute.xlu0 %2740 }
0x14b8   : > { %3383 = vrcp.f32 %v2741_v44 }
0x14c1   : > { %v3382_v37 = vpop.eup %3381 }
0x14c2   : > { %v2700_v39 = vmul.f32 %v3382_v37, %v2692_v24 }
0x14c4   : > { %v2707_v43 = vmul.f32 %v3025_v38, %v2700_v39 }
0x14c5   : > { %v3384_v40 = vpop.eup %3383 }
0x14c6   : > { %v2714_v45 = vadd.f32 %v3026_v42, %v2707_v43 }
0x14c8   : > { %v2721_v3 = vmul.f32 %v2719_v46, %v2714_v45 }
0x14ca   : > { %v2722_v47 = vsel %vm973_vm2, %v2721_v3, 0.0 }
0x14cb   : > { %v2723_v48 = vrot.slane %v2722_v47, 4 }
0x14cd   : > { %v2724_v49 = vadd.f32 %v2723_v48, %v2722_v47 }
0x14cf   : > { %v2725_v41 = vrot.slane %v2724_v49, 2 }
0x14d1   : > { %v2726_v55 = vadd.f32 %v2725_v41, %v2724_v49 }
0x14d3   : > { %v2727_v57 = vrot.slane %v2726_v55, 1 }
0x14d5   : > { %v2728_v59 = vadd.f32 %v2727_v57, %v2726_v55 }
0x14d7   : > { %v2744_v61 = vmul.f32 %v3384_v40, %v2728_v59 }
0x14d9   : > { %v2757_v62 = vadd.f32 %v2756_v60, %v2744_v61 }
0x14db   : > { %v2759_v54 = vadd.f32 %v2758_v50, %v2757_v62 }
0x14dd   : > { %v2760_v63 = vpack.c.bf16 %v2759_v54, %v2759_v54 }
0x14df   : > { %3290 = vmatmul.mubr.msk.bf16.vlgmr.msra.gmra.mxu1 %vm973_vm2, %v2760_v63 }
0x159f   : > { %v2815_v0 = vpop.f32.mrf.mxu1 }
0x15a0   : > { %v2816_v2 = vadd.f32 %v2815_v0, %v2765_v13 }
0x15a1   : > { %v3291_v53 = vpop.f32.mrf.mxu1 }
0x15a2   : > { %v2821_v52 = vmax.f32 %v2816_v2, 0.0 }
0x15a3   : > { %v2818_v5 = vpop.f32.mrf.mxu1 }
0x15a4   : > { %v2823_v6 = vmul.f32 %v2822_v4, %v2821_v52 }
0x15a5   : > { %v3292_v7 = vpop.f32.mrf.mxu1 }
0x15a6   : > { %v2825_v8 = vsel %vm2824_vm9, %v2823_v6, 0.0 }
0x15a7   : > { %2826 = vadd.xlane.f32.xlu1 %v2825_v8 }
0x1630   : > { %v2827_v10 = vpop.xlane.xlu1 %2826 }
0x1631   : > { %v2829_v11 = vadd.f32 %v2828_v9, %v2827_v10 }
0x1633   : > { %2831 = vst.msk [vmem:[%s902_s4] sm:$0x1] %vm2830_vm10, %v2829_v11 }
0x1634 PF: > { %s4086_s0 = sld [smem:[#allocation3_spill]] }
0x163a   : > { %s40_s9 = sadd.s32 1, %s4086_s0  }
0x163b   : > { %p37_p4 = scmp.ge.s32.totalorder %s40_s9, 4  }
0x163d   :  { %39 = sbr.rel (!%p37_p4) target bundleno = 14 (0xe), region = 186 }

</bundles_post_ra>
